<compile_context>
chip_gen: v6e
topology: v6e:2x2x1
jax: 0.10.0
libtpu: 0.0.40
codegen_flags: <defaults>
</compile_context>

<pallas_src>
import functools
import math

import jax
import jax.numpy as jnp
from jax.experimental import pallas as pl
from jax.experimental.pallas import tpu as pltpu


# Scoped-VMEM budget safe on all generations (v7x has 64 MiB physical).
_VMEM_LIMIT = 32 * 1024 * 1024


def _pick_tile(dim, pref, align):
    """Largest tile <= pref that is a multiple of `align` and divides `dim`;
    falls back to the full dimension (always a legal TPU block)."""
    if dim <= pref:
        return dim
    t = (pref // align) * align
    while t >= align:
        if dim % t == 0:
            return t
        t -= align
    return dim


# ----------------------------------------------------------------------------
# Pallas kernels
# ----------------------------------------------------------------------------

def _ln_matmul_kernel(x_ref, g_ref, b_ref, w_ref, bias_ref, o_ref, y_ref, *,
                      apply_gelu):
    """o = [gelu](LayerNorm(x) @ W + b).
    x:[tm,K] f32, g/b:[1,K] f32, W:[K,tn] bf16, bias:[1,tn] f32, o:[tm,tn] bf16.
    LayerNorm is computed once per M-tile (j == 0) into y_ref (bf16) and reused
    across all N-tiles, so the grid's N axis must be 'arbitrary'."""
    @pl.when(pl.program_id(1) == 0)
    def _():
        x = x_ref[...].astype(jnp.float32)
        mu = jnp.mean(x, axis=-1, keepdims=True)
        var = jnp.mean((x - mu) ** 2, axis=-1, keepdims=True)
        y = (x - mu) * jax.lax.rsqrt(var + 1e-5)
        y = y * g_ref[...] + b_ref[...]
        y_ref[...] = y.astype(y_ref.dtype)          # bf16 for the MXU

    out = jnp.dot(y_ref[...], w_ref[...], preferred_element_type=jnp.float32)
    out = out + bias_ref[...]
    if apply_gelu:
        # exact (erf) gelu, matching torch.nn.functional.gelu default
        out = 0.5 * out * (1.0 + jax.lax.erf(out * (1.0 / math.sqrt(2.0))))
    o_ref[...] = out.astype(o_ref.dtype)


def _linear_residual_single_kernel(x_ref, w_ref, bias_ref, res_ref, o_ref):
    """o = res + x @ W + b (whole K in one tile -> no accumulator scratch).
    x:[tm,K] bf16, W:[K,tn] bf16, bias:[1,tn] f32, res/o:[tm,tn] f32."""
    acc = jnp.dot(x_ref[...], w_ref[...], preferred_element_type=jnp.float32)
    o_ref[...] = (acc + bias_ref[...]
                  + res_ref[...].astype(jnp.float32)).astype(o_ref.dtype)


def _linear_residual_kernel(x_ref, w_ref, bias_ref, res_ref, o_ref, acc_ref):
    """o = res + x @ W + b, K-tiled with a f32 accumulator.
    x:[tm,tk] bf16, W:[tk,tn] bf16, bias:[1,tn] f32, res/o:[tm,tn] f32."""
    @pl.when(pl.program_id(2) == 0)
    def _():
        acc_ref[...] = jnp.zeros_like(acc_ref)

    acc_ref[...] += jnp.dot(x_ref[...], w_ref[...],
                            preferred_element_type=jnp.float32)

    @pl.when(pl.program_id(2) == pl.num_programs(2) - 1)
    def _():
        o_ref[...] = (acc_ref[...] + bias_ref[...]
                      + res_ref[...].astype(jnp.float32)).astype(o_ref.dtype)


def _attention_kernel(mix_ref, o_ref, *, num_heads, head_dim, scale):
    """All heads of one batch element per grid step.
    mix block: [S, 1, 1, 3h] bf16 (head-interleaved q|k|v per head).
    out block: [S, 1, 1, h]  bf16 (heads concatenated -> lane-dense h)."""
    m = mix_ref[...][:, 0, 0, :]                     # [S, 3h] bf16
    ctx_heads = []
    for h_i in range(num_heads):
        base = h_i * 3 * head_dim
        q = m[:, base:base + head_dim]               # [S, hd]
        k = m[:, base + head_dim:base + 2 * head_dim]
        v = m[:, base + 2 * head_dim:base + 3 * head_dim]
        # scaled q k^T; baddbmm beta-term over an uninitialized buffer == 0
        sc = jnp.einsum('qd,kd->qk', q, k,
                        preferred_element_type=jnp.float32) * scale
        mx = jnp.max(sc, axis=-1, keepdims=True)
        e = jnp.exp(sc - mx)
        p = e * pl.reciprocal(jnp.sum(e, axis=-1, keepdims=True), approx=True)
        # attention_dropout(p=0.7) -> identity (eval mode)
        ctx_heads.append(jnp.dot(p.astype(v.dtype), v,
                                 preferred_element_type=jnp.float32))
    ctx = jnp.concatenate(ctx_heads, axis=-1)        # [S, h]
    o_ref[...] = ctx[:, None, None, :].astype(o_ref.dtype)


# ----------------------------------------------------------------------------
# pallas_call wrappers
# ----------------------------------------------------------------------------

def ln_matmul(x2d, gamma, beta, w, bias, apply_gelu):
    M, K = x2d.shape
    _, N = w.shape
    tm = _pick_tile(M, 256, 8)
    tn = _pick_tile(N, 512, 128)
    kernel = functools.partial(_ln_matmul_kernel, apply_gelu=apply_gelu)
    return pl.pallas_call(
        kernel,
        out_shape=jax.ShapeDtypeStruct((M, N), jnp.bfloat16),
        grid=(M // tm, N // tn),
        in_specs=[
            pl.BlockSpec((tm, K), lambda i, j: (i, 0)),
            pl.BlockSpec((1, K), lambda i, j: (0, 0)),
            pl.BlockSpec((1, K), lambda i, j: (0, 0)),
            pl.BlockSpec((K, tn), lambda i, j: (0, j)),
            pl.BlockSpec((1, tn), lambda i, j: (0, j)),
        ],
        out_specs=pl.BlockSpec((tm, tn), lambda i, j: (i, j)),
        scratch_shapes=[pltpu.VMEM((tm, K), jnp.bfloat16)],
        compiler_params=pltpu.CompilerParams(
            # N axis must stay 'arbitrary': the LN scratch written at j==0 is
            # reused by the later N-tiles of the same M-tile.
            dimension_semantics=("parallel", "arbitrary"),
            vmem_limit_bytes=_VMEM_LIMIT),
    )(x2d, gamma, beta, w, bias)


def linear_residual(x2d, w, bias, res2d):
    M, K = x2d.shape
    _, N = w.shape
    tm = _pick_tile(M, 256, 8)
    tn = _pick_tile(N, 512, 128)
    tk = _pick_tile(K, 512, 128)

    if tk == K:
        # Whole reduction fits in one tile: no accumulator / phase logic needed.
        return pl.pallas_call(
            _linear_residual_single_kernel,
            out_shape=jax.ShapeDtypeStruct((M, N), res2d.dtype),
            grid=(M // tm, N // tn),
            in_specs=[
                pl.BlockSpec((tm, K), lambda i, j: (i, 0)),
                pl.BlockSpec((K, tn), lambda i, j: (0, j)),
                pl.BlockSpec((1, tn), lambda i, j: (0, j)),
                pl.BlockSpec((tm, tn), lambda i, j: (i, j)),
            ],
            out_specs=pl.BlockSpec((tm, tn), lambda i, j: (i, j)),
            compiler_params=pltpu.CompilerParams(
                dimension_semantics=("parallel", "parallel"),
                vmem_limit_bytes=_VMEM_LIMIT),
        )(x2d, w, bias, res2d)

    return pl.pallas_call(
        _linear_residual_kernel,
        out_shape=jax.ShapeDtypeStruct((M, N), res2d.dtype),
        grid=(M // tm, N // tn, K // tk),
        in_specs=[
            pl.BlockSpec((tm, tk), lambda i, j, k: (i, k)),
            pl.BlockSpec((tk, tn), lambda i, j, k: (k, j)),
            pl.BlockSpec((1, tn), lambda i, j, k: (0, j)),
            pl.BlockSpec((tm, tn), lambda i, j, k: (i, j)),
        ],
        out_specs=pl.BlockSpec((tm, tn), lambda i, j, k: (i, j)),
        scratch_shapes=[pltpu.VMEM((tm, tn), jnp.float32)],
        compiler_params=pltpu.CompilerParams(
            dimension_semantics=("parallel", "parallel", "arbitrary"),
            vmem_limit_bytes=_VMEM_LIMIT),
    )(x2d, w, bias, res2d)


def attention_core(mixed_sbh, num_heads):
    """mixed_sbh: [s, b, 3h] bf16 -> context [s, b, h] bf16."""
    s, b, three_h = mixed_sbh.shape
    h = three_h // 3
    head_dim = h // num_heads
    scale = 1.0 / math.sqrt(head_dim)
    # Dummy unit axis keeps the batch-blocked dim out of the last-two (8,128)
    # constrained block dims.
    mixed4 = mixed_sbh.reshape(s, b, 1, three_h)
    kernel = functools.partial(_attention_kernel, num_heads=num_heads,
                               head_dim=head_dim, scale=scale)
    out = pl.pallas_call(
        kernel,
        out_shape=jax.ShapeDtypeStruct((s, b, 1, h), mixed_sbh.dtype),
        grid=(b,),
        in_specs=[pl.BlockSpec((s, 1, 1, three_h), lambda bi: (0, bi, 0, 0))],
        out_specs=pl.BlockSpec((s, 1, 1, h), lambda bi: (0, bi, 0, 0)),
        compiler_params=pltpu.CompilerParams(
            dimension_semantics=("parallel",),
            vmem_limit_bytes=_VMEM_LIMIT),
    )(mixed4)
    return out.reshape(s, b, h)


# ----------------------------------------------------------------------------
# Blocks (pure-reshape glue only; all math in Pallas)
# ----------------------------------------------------------------------------

def attention_block(x, p, num_heads):
    s, b, h = x.shape
    x2d = x.reshape(s * b, h)                                   # residual
    # LayerNorm + QKV projection (fused, tiled, bf16 MXU)
    mixed = ln_matmul(x2d, p["ln_g"], p["ln_b"], p["w_qkv"], p["b_qkv"],
                      apply_gelu=False)                          # [s*b, 3h] bf16
    # Attention over all heads per batch element; head-interleaved q|k|v split
    # matches mixed.view(s, b, n, 3*hd) -> split_along_last_dim in the reference.
    ctx = attention_core(mixed.reshape(s, b, 3 * h), num_heads)  # [s, b, h] bf16
    # dense projection + residual (Dropout(0.7) -> identity in eval mode)
    out2d = linear_residual(ctx.reshape(s * b, h), p["w_dense"], p["b_dense"],
                            x2d)
    return out2d.reshape(s, b, h)


def mlp_block(x, p):
    s, b, h = x.shape
    x2d = x.reshape(s * b, h)                                    # residual
    a = ln_matmul(x2d, p["ln_g"], p["ln_b"], p["w1"], p["b1"],
                  apply_gelu=True)                               # [s*b, 4h] bf16
    out2d = linear_residual(a, p["w2"], p["b2"], x2d)
    return out2d.reshape(s, b, h)


def test_model_forward(x, params, num_heads):
    for attn_p, mlp_p in params:
        x = attention_block(x, attn_p, num_heads)
        # dist.all_reduce(x) -> identity on a single device
        x = mlp_block(x, mlp_p)
        # dist.all_reduce(x) -> identity on a single device
    return x


# ----------------------------------------------------------------------------
# Deterministic parameter construction (weights in bf16, biases/LN in f32)
# ----------------------------------------------------------------------------

def init_params(key, num_layer, h):
    params = []
    for _ in range(num_layer):
        key, k1, k2, k3, k4 = jax.random.split(key, 5)
        attn = {
            "ln_g": jnp.ones((1, h), jnp.float32),
            "ln_b": jnp.zeros((1, h), jnp.float32),
            "w_qkv": (0.02 * jax.random.normal(k1, (h, 3 * h))).astype(jnp.bfloat16),
            "b_qkv": 0.01 * jax.random.normal(k2, (1, 3 * h), jnp.float32),
            "w_dense": (0.02 * jax.random.normal(k3, (h, h))).astype(jnp.bfloat16),
            "b_dense": 0.01 * jax.random.normal(k4, (1, h), jnp.float32),
        }
        key, k1, k2, k3, k4 = jax.random.split(key, 5)
        mlp = {
            "ln_g": jnp.ones((1, h), jnp.float32),
            "ln_b": jnp.zeros((1, h), jnp.float32),
            "w1": (0.02 * jax.random.normal(k1, (h, 4 * h))).astype(jnp.bfloat16),
            "b1": 0.01 * jax.random.normal(k2, (1, 4 * h), jnp.float32),
            "w2": (0.02 * jax.random.normal(k3, (4 * h, h))).astype(jnp.bfloat16),
            "b2": 0.01 * jax.random.normal(k4, (1, h), jnp.float32),
        }
        params.append((attn, mlp))
    return params


if __name__ == "__main__":
    num_layer = 2
    h = 32          # hidden size
    n = 4           # attention heads
    s = 8           # sequence length
    b = 2           # batch size

    key = jax.random.PRNGKey(0)
    key, kx = jax.random.split(key)
    x = jax.random.normal(kx, (s, b, h), jnp.float32)   # [s, b, h]

    params = init_params(key, num_layer, h)

    fwd = jax.jit(functools.partial(test_model_forward, num_heads=n))
    out = jax.block_until_ready(fwd(x, params))

    assert out.shape == (s, b, h)
    assert bool(jnp.all(jnp.isfinite(out)))
    print("KERNEL_OK")
</pallas_src>

<mosaic_0001>
module attributes {stable_mosaic.version = 11 : i64} {
  func.func @_attention_kernel(%arg0: i32, %arg1: memref<8x1x1x96xbf16, #tpu.memory_space<vmem>>, %arg2: memref<8x1x1x32xbf16, #tpu.memory_space<vmem>>) attributes {dimension_semantics = [#tpu.dimension_semantics<parallel>], iteration_bounds = array<i64: 2>, scalar_prefetch = 0 : i64, scratch_operands = 0 : i64, tpu.core_type = #tpu.core_type<tc>, window_params = [{transform_indices = @transform_0, window_bounds = array<i64: 8, 1, 1, 96>}, {transform_indices = @transform_1, window_bounds = array<i64: 8, 1, 1, 32>}]} {
    %c0 = arith.constant 0 : index
    %c0_0 = arith.constant 0 : index
    %c0_1 = arith.constant 0 : index
    %c0_2 = arith.constant 0 : index
    %0 = vector.load %arg1[%c0, %c0_0, %c0_1, %c0_2] : memref<8x1x1x96xbf16, #tpu.memory_space<vmem>>, vector<8x1x1x96xbf16>
    %1 = vector.shape_cast %0 : vector<8x1x1x96xbf16> to vector<8x96xbf16>
    %2 = vector.extract_strided_slice %1 {offsets = [0, 0], sizes = [8, 8], strides = [1, 1]} : vector<8x96xbf16> to vector<8x8xbf16>
    %3 = vector.extract_strided_slice %1 {offsets = [0, 8], sizes = [8, 8], strides = [1, 1]} : vector<8x96xbf16> to vector<8x8xbf16>
    %4 = vector.extract_strided_slice %1 {offsets = [0, 16], sizes = [8, 8], strides = [1, 1]} : vector<8x96xbf16> to vector<8x8xbf16>
    "tpu.trace_start"() <{level = 10 : i32, message = "qd,kd->qk"}> : () -> ()
    %cst = arith.constant dense<0.000000e+00> : vector<8x8xf32>
    %5 = tpu.matmul %2, %3, %cst {dimension_numbers = #tpu.dot_dimension_numbers<[1], [1], [0], [0], [0, 0, 1, 0], [], []>} : vector<8x8xbf16>, vector<8x8xbf16>, vector<8x8xf32> -> vector<8x8xf32>
    "tpu.trace_stop"() : () -> ()
    %cst_3 = arith.constant 0.353553385 : f32
    %6 = vector.broadcast %cst_3 : f32 to vector<8x8xf32>
    %7 = arith.mulf %5, %6 : vector<8x8xf32>
    %cst_4 = arith.constant dense<0xFF800000> : vector<8xf32>
    %8 = vector.multi_reduction <maximumf>, %7, %cst_4 [1] : vector<8x8xf32> to vector<8xf32>
    %9 = vector.shape_cast %8 : vector<8xf32> to vector<8x1xf32>
    %10 = vector.broadcast %9 : vector<8x1xf32> to vector<8x8xf32>
    %11 = arith.subf %7, %10 : vector<8x8xf32>
    %12 = math.exp %11 : vector<8x8xf32>
    %cst_5 = arith.constant dense<0.000000e+00> : vector<8xf32>
    %13 = vector.multi_reduction <add>, %12, %cst_5 [1] : vector<8x8xf32> to vector<8xf32>
    %14 = vector.shape_cast %13 : vector<8xf32> to vector<8x1xf32>
    %15 = tpu.reciprocal %14 {approx = true} : vector<8x1xf32> -> vector<8x1xf32>
    %16 = vector.broadcast %15 : vector<8x1xf32> to vector<8x8xf32>
    %17 = arith.mulf %12, %16 : vector<8x8xf32>
    %18 = arith.truncf %17 : vector<8x8xf32> to vector<8x8xbf16>
    %cst_6 = arith.constant dense<0.000000e+00> : vector<8x8xf32>
    %19 = tpu.matmul %18, %4, %cst_6 {dimension_numbers = #tpu.dot_dimension_numbers<[1], [0], [0], [1], [0, 0, 1, 1], [], []>} : vector<8x8xbf16>, vector<8x8xbf16>, vector<8x8xf32> -> vector<8x8xf32>
    %20 = vector.extract_strided_slice %1 {offsets = [0, 24], sizes = [8, 8], strides = [1, 1]} : vector<8x96xbf16> to vector<8x8xbf16>
    %21 = vector.extract_strided_slice %1 {offsets = [0, 32], sizes = [8, 8], strides = [1, 1]} : vector<8x96xbf16> to vector<8x8xbf16>
    %22 = vector.extract_strided_slice %1 {offsets = [0, 40], sizes = [8, 8], strides = [1, 1]} : vector<8x96xbf16> to vector<8x8xbf16>
    "tpu.trace_start"() <{level = 10 : i32, message = "qd,kd->qk"}> : () -> ()
    %cst_7 = arith.constant dense<0.000000e+00> : vector<8x8xf32>
    %23 = tpu.matmul %20, %21, %cst_7 {dimension_numbers = #tpu.dot_dimension_numbers<[1], [1], [0], [0], [0, 0, 1, 0], [], []>} : vector<8x8xbf16>, vector<8x8xbf16>, vector<8x8xf32> -> vector<8x8xf32>
    "tpu.trace_stop"() : () -> ()
    %cst_8 = arith.constant 0.353553385 : f32
    %24 = vector.broadcast %cst_8 : f32 to vector<8x8xf32>
    %25 = arith.mulf %23, %24 : vector<8x8xf32>
    %cst_9 = arith.constant dense<0xFF800000> : vector<8xf32>
    %26 = vector.multi_reduction <maximumf>, %25, %cst_9 [1] : vector<8x8xf32> to vector<8xf32>
    %27 = vector.shape_cast %26 : vector<8xf32> to vector<8x1xf32>
    %28 = vector.broadcast %27 : vector<8x1xf32> to vector<8x8xf32>
    %29 = arith.subf %25, %28 : vector<8x8xf32>
    %30 = math.exp %29 : vector<8x8xf32>
    %cst_10 = arith.constant dense<0.000000e+00> : vector<8xf32>
    %31 = vector.multi_reduction <add>, %30, %cst_10 [1] : vector<8x8xf32> to vector<8xf32>
    %32 = vector.shape_cast %31 : vector<8xf32> to vector<8x1xf32>
    %33 = tpu.reciprocal %32 {approx = true} : vector<8x1xf32> -> vector<8x1xf32>
    %34 = vector.broadcast %33 : vector<8x1xf32> to vector<8x8xf32>
    %35 = arith.mulf %30, %34 : vector<8x8xf32>
    %36 = arith.truncf %35 : vector<8x8xf32> to vector<8x8xbf16>
    %cst_11 = arith.constant dense<0.000000e+00> : vector<8x8xf32>
    %37 = tpu.matmul %36, %22, %cst_11 {dimension_numbers = #tpu.dot_dimension_numbers<[1], [0], [0], [1], [0, 0, 1, 1], [], []>} : vector<8x8xbf16>, vector<8x8xbf16>, vector<8x8xf32> -> vector<8x8xf32>
    %38 = vector.extract_strided_slice %1 {offsets = [0, 48], sizes = [8, 8], strides = [1, 1]} : vector<8x96xbf16> to vector<8x8xbf16>
    %39 = vector.extract_strided_slice %1 {offsets = [0, 56], sizes = [8, 8], strides = [1, 1]} : vector<8x96xbf16> to vector<8x8xbf16>
    %40 = vector.extract_strided_slice %1 {offsets = [0, 64], sizes = [8, 8], strides = [1, 1]} : vector<8x96xbf16> to vector<8x8xbf16>
    "tpu.trace_start"() <{level = 10 : i32, message = "qd,kd->qk"}> : () -> ()
    %cst_12 = arith.constant dense<0.000000e+00> : vector<8x8xf32>
    %41 = tpu.matmul %38, %39, %cst_12 {dimension_numbers = #tpu.dot_dimension_numbers<[1], [1], [0], [0], [0, 0, 1, 0], [], []>} : vector<8x8xbf16>, vector<8x8xbf16>, vector<8x8xf32> -> vector<8x8xf32>
    "tpu.trace_stop"() : () -> ()
    %cst_13 = arith.constant 0.353553385 : f32
    %42 = vector.broadcast %cst_13 : f32 to vector<8x8xf32>
    %43 = arith.mulf %41, %42 : vector<8x8xf32>
    %cst_14 = arith.constant dense<0xFF800000> : vector<8xf32>
    %44 = vector.multi_reduction <maximumf>, %43, %cst_14 [1] : vector<8x8xf32> to vector<8xf32>
    %45 = vector.shape_cast %44 : vector<8xf32> to vector<8x1xf32>
    %46 = vector.broadcast %45 : vector<8x1xf32> to vector<8x8xf32>
    %47 = arith.subf %43, %46 : vector<8x8xf32>
    %48 = math.exp %47 : vector<8x8xf32>
    %cst_15 = arith.constant dense<0.000000e+00> : vector<8xf32>
    %49 = vector.multi_reduction <add>, %48, %cst_15 [1] : vector<8x8xf32> to vector<8xf32>
    %50 = vector.shape_cast %49 : vector<8xf32> to vector<8x1xf32>
    %51 = tpu.reciprocal %50 {approx = true} : vector<8x1xf32> -> vector<8x1xf32>
    %52 = vector.broadcast %51 : vector<8x1xf32> to vector<8x8xf32>
    %53 = arith.mulf %48, %52 : vector<8x8xf32>
    %54 = arith.truncf %53 : vector<8x8xf32> to vector<8x8xbf16>
    %cst_16 = arith.constant dense<0.000000e+00> : vector<8x8xf32>
    %55 = tpu.matmul %54, %40, %cst_16 {dimension_numbers = #tpu.dot_dimension_numbers<[1], [0], [0], [1], [0, 0, 1, 1], [], []>} : vector<8x8xbf16>, vector<8x8xbf16>, vector<8x8xf32> -> vector<8x8xf32>
    %56 = vector.extract_strided_slice %1 {offsets = [0, 72], sizes = [8, 8], strides = [1, 1]} : vector<8x96xbf16> to vector<8x8xbf16>
    %57 = vector.extract_strided_slice %1 {offsets = [0, 80], sizes = [8, 8], strides = [1, 1]} : vector<8x96xbf16> to vector<8x8xbf16>
    %58 = vector.extract_strided_slice %1 {offsets = [0, 88], sizes = [8, 8], strides = [1, 1]} : vector<8x96xbf16> to vector<8x8xbf16>
    "tpu.trace_start"() <{level = 10 : i32, message = "qd,kd->qk"}> : () -> ()
    %cst_17 = arith.constant dense<0.000000e+00> : vector<8x8xf32>
    %59 = tpu.matmul %56, %57, %cst_17 {dimension_numbers = #tpu.dot_dimension_numbers<[1], [1], [0], [0], [0, 0, 1, 0], [], []>} : vector<8x8xbf16>, vector<8x8xbf16>, vector<8x8xf32> -> vector<8x8xf32>
    "tpu.trace_stop"() : () -> ()
    %cst_18 = arith.constant 0.353553385 : f32
    %60 = vector.broadcast %cst_18 : f32 to vector<8x8xf32>
    %61 = arith.mulf %59, %60 : vector<8x8xf32>
    %cst_19 = arith.constant dense<0xFF800000> : vector<8xf32>
    %62 = vector.multi_reduction <maximumf>, %61, %cst_19 [1] : vector<8x8xf32> to vector<8xf32>
    %63 = vector.shape_cast %62 : vector<8xf32> to vector<8x1xf32>
    %64 = vector.broadcast %63 : vector<8x1xf32> to vector<8x8xf32>
    %65 = arith.subf %61, %64 : vector<8x8xf32>
    %66 = math.exp %65 : vector<8x8xf32>
    %cst_20 = arith.constant dense<0.000000e+00> : vector<8xf32>
    %67 = vector.multi_reduction <add>, %66, %cst_20 [1] : vector<8x8xf32> to vector<8xf32>
    %68 = vector.shape_cast %67 : vector<8xf32> to vector<8x1xf32>
    %69 = tpu.reciprocal %68 {approx = true} : vector<8x1xf32> -> vector<8x1xf32>
    %70 = vector.broadcast %69 : vector<8x1xf32> to vector<8x8xf32>
    %71 = arith.mulf %66, %70 : vector<8x8xf32>
    %72 = arith.truncf %71 : vector<8x8xf32> to vector<8x8xbf16>
    %cst_21 = arith.constant dense<0.000000e+00> : vector<8x8xf32>
    %73 = tpu.matmul %72, %58, %cst_21 {dimension_numbers = #tpu.dot_dimension_numbers<[1], [0], [0], [1], [0, 0, 1, 1], [], []>} : vector<8x8xbf16>, vector<8x8xbf16>, vector<8x8xf32> -> vector<8x8xf32>
    %74 = tpu.concatenate %19, %37, %55, %73 in 1 : vector<8x8xf32>, vector<8x8xf32>, vector<8x8xf32>, vector<8x8xf32> -> vector<8x32xf32>
    %75 = vector.shape_cast %74 : vector<8x32xf32> to vector<8x1x1x32xf32>
    %76 = arith.truncf %75 : vector<8x1x1x32xf32> to vector<8x1x1x32xbf16>
    %c0_22 = arith.constant 0 : index
    %c0_23 = arith.constant 0 : index
    %c0_24 = arith.constant 0 : index
    %c0_25 = arith.constant 0 : index
    %77 = vector.load %arg2[%c0_22, %c0_23, %c0_24, %c0_25] : memref<8x1x1x32xbf16, #tpu.memory_space<vmem>>, vector<8x1x1x32xbf16>
    tpu.vector_store %arg2[%c0_22, %c0_23, %c0_24, %c0_25], %76 {strides = array<i32>} : memref<8x1x1x32xbf16, #tpu.memory_space<vmem>>, vector<8x1x1x32xbf16>,
    return
  }
  func.func @transform_0(%arg0: i32) -> (i32, i32, i32, i32) {
    %c0_i32 = arith.constant 0 : i32
    %c0_i32_0 = arith.constant 0 : i32
    %c0_i32_1 = arith.constant 0 : i32
    %c0_i32_2 = arith.constant 0 : i32
    return %c0_i32, %arg0, %c0_i32_0, %c0_i32_1 : i32, i32, i32, i32
  }
  func.func @transform_1(%arg0: i32) -> (i32, i32, i32, i32) {
    %c0_i32 = arith.constant 0 : i32
    %c0_i32_0 = arith.constant 0 : i32
    %c0_i32_1 = arith.constant 0 : i32
    %c0_i32_2 = arith.constant 0 : i32
    return %c0_i32, %arg0, %c0_i32_0, %c0_i32_1 : i32, i32, i32, i32
  }
}

module attributes {stable_mosaic.version = 11 : i64} {
  func.func @_ln_matmul_kernel(%arg0: i32, %arg1: i32, %arg2: memref<16x32xf32, #tpu.memory_space<vmem>>, %arg3: memref<1x32xf32, #tpu.memory_space<vmem>>, %arg4: memref<1x32xf32, #tpu.memory_space<vmem>>, %arg5: memref<32x96xbf16, #tpu.memory_space<vmem>>, %arg6: memref<1x96xf32, #tpu.memory_space<vmem>>, %arg7: memref<16x96xbf16, #tpu.memory_space<vmem>>, %arg8: memref<16x32xbf16, #tpu.memory_space<vmem>>) attributes {dimension_semantics = [#tpu.dimension_semantics<parallel>, #tpu.dimension_semantics<arbitrary>], iteration_bounds = array<i64: 1, 1>, scalar_prefetch = 0 : i64, scratch_operands = 1 : i64, tpu.core_type = #tpu.core_type<tc>, window_params = [{transform_indices = @transform_0, window_bounds = array<i64: 16, 32>}, {pipeline_mode = #tpu.pipeline_mode<synchronous>, transform_indices = @transform_1, window_bounds = array<i64: 1, 32>}, {pipeline_mode = #tpu.pipeline_mode<synchronous>, transform_indices = @transform_2, window_bounds = array<i64: 1, 32>}, {transform_indices = @transform_3, window_bounds = array<i64: 32, 96>}, {transform_indices = @transform_4, window_bounds = array<i64: 1, 96>}, {transform_indices = @transform_5, window_bounds = array<i64: 16, 96>}]} {
    %c0_i32 = arith.constant 0 : i32
    %0 = arith.cmpi eq, %arg1, %c0_i32 : i32
    %1 = arith.extui %0 : i1 to i32
    %c0_i32_0 = arith.constant 0 : i32
    %2 = arith.cmpi ne, %1, %c0_i32_0 : i32
    scf.if %2 {
      %c0_8 = arith.constant 0 : index
      %c0_9 = arith.constant 0 : index
      %11 = vector.load %arg2[%c0_8, %c0_9] : memref<16x32xf32, #tpu.memory_space<vmem>>, vector<16x32xf32>
      %cst_10 = arith.constant dense<0.000000e+00> : vector<16xf32>
      %12 = vector.multi_reduction <add>, %11, %cst_10 [1] : vector<16x32xf32> to vector<16xf32>
      %13 = vector.shape_cast %12 : vector<16xf32> to vector<16x1xf32>
      %cst_11 = arith.constant 3.200000e+01 : f32
      %14 = vector.broadcast %cst_11 : f32 to vector<16x1xf32>
      %15 = arith.divf %13, %14 : vector<16x1xf32>
      %16 = vector.broadcast %15 : vector<16x1xf32> to vector<16x32xf32>
      %17 = arith.subf %11, %16 : vector<16x32xf32>
      %18 = arith.mulf %17, %17 : vector<16x32xf32>
      %cst_12 = arith.constant dense<0.000000e+00> : vector<16xf32>
      %19 = vector.multi_reduction <add>, %18, %cst_12 [1] : vector<16x32xf32> to vector<16xf32>
      %20 = vector.shape_cast %19 : vector<16xf32> to vector<16x1xf32>
      %cst_13 = arith.constant 3.200000e+01 : f32
      %21 = vector.broadcast %cst_13 : f32 to vector<16x1xf32>
      %22 = arith.divf %20, %21 : vector<16x1xf32>
      %23 = vector.broadcast %15 : vector<16x1xf32> to vector<16x32xf32>
      %24 = arith.subf %11, %23 : vector<16x32xf32>
      %cst_14 = arith.constant 9.99999974E-6 : f32
      %25 = vector.broadcast %cst_14 : f32 to vector<16x1xf32>
      %26 = arith.addf %22, %25 : vector<16x1xf32>
      %27 = math.rsqrt %26 : vector<16x1xf32>
      %28 = vector.broadcast %27 : vector<16x1xf32> to vector<16x32xf32>
      %29 = arith.mulf %24, %28 : vector<16x32xf32>
      %c0_15 = arith.constant 0 : index
      %c0_16 = arith.constant 0 : index
      %30 = vector.load %arg3[%c0_15, %c0_16] : memref<1x32xf32, #tpu.memory_space<vmem>>, vector<1x32xf32>
      %31 = vector.broadcast %30 : vector<1x32xf32> to vector<16x32xf32>
      %32 = arith.mulf %29, %31 : vector<16x32xf32>
      %c0_17 = arith.constant 0 : index
      %c0_18 = arith.constant 0 : index
      %33 = vector.load %arg4[%c0_17, %c0_18] : memref<1x32xf32, #tpu.memory_space<vmem>>, vector<1x32xf32>
      %34 = vector.broadcast %33 : vector<1x32xf32> to vector<16x32xf32>
      %35 = arith.addf %32, %34 : vector<16x32xf32>
      %36 = arith.truncf %35 : vector<16x32xf32> to vector<16x32xbf16>
      %c0_19 = arith.constant 0 : index
      %c0_20 = arith.constant 0 : index
      %37 = vector.load %arg8[%c0_19, %c0_20] : memref<16x32xbf16, #tpu.memory_space<vmem>>, vector<16x32xbf16>
      tpu.vector_store %arg8[%c0_19, %c0_20], %36 {strides = array<i32>} : memref<16x32xbf16, #tpu.memory_space<vmem>>, vector<16x32xbf16>,
    } else {
    }
    %c0 = arith.constant 0 : index
    %c0_1 = arith.constant 0 : index
    %3 = vector.load %arg8[%c0, %c0_1] : memref<16x32xbf16, #tpu.memory_space<vmem>>, vector<16x32xbf16>
    %c0_2 = arith.constant 0 : index
    %c0_3 = arith.constant 0 : index
    %4 = vector.load %arg5[%c0_2, %c0_3] : memref<32x96xbf16, #tpu.memory_space<vmem>>, vector<32x96xbf16>
    %cst = arith.constant dense<0.000000e+00> : vector<16x96xf32>
    %5 = tpu.matmul %3, %4, %cst {dimension_numbers = #tpu.dot_dimension_numbers<[1], [0], [0], [1], [0, 0, 1, 1], [], []>} : vector<16x32xbf16>, vector<32x96xbf16>, vector<16x96xf32> -> vector<16x96xf32>
    %c0_4 = arith.constant 0 : index
    %c0_5 = arith.constant 0 : index
    %6 = vector.load %arg6[%c0_4, %c0_5] : memref<1x96xf32, #tpu.memory_space<vmem>>, vector<1x96xf32>
    %7 = vector.broadcast %6 : vector<1x96xf32> to vector<16x96xf32>
    %8 = arith.addf %5, %7 : vector<16x96xf32>
    %9 = arith.truncf %8 : vector<16x96xf32> to vector<16x96xbf16>
    %c0_6 = arith.constant 0 : index
    %c0_7 = arith.constant 0 : index
    %10 = vector.load %arg7[%c0_6, %c0_7] : memref<16x96xbf16, #tpu.memory_space<vmem>>, vector<16x96xbf16>
    tpu.vector_store %arg7[%c0_6, %c0_7], %9 {strides = array<i32>} : memref<16x96xbf16, #tpu.memory_space<vmem>>, vector<16x96xbf16>,
    return
  }
  func.func @transform_0(%arg0: i32, %arg1: i32) -> (i32, i32) {
    %c0_i32 = arith.constant 0 : i32
    %c0_i32_0 = arith.constant 0 : i32
    return %arg0, %c0_i32 : i32, i32
  }
  func.func @transform_1(%arg0: i32, %arg1: i32) -> (i32, i32) {
    %c0_i32 = arith.constant 0 : i32
    %c0_i32_0 = arith.constant 0 : i32
    %c0_i32_1 = arith.constant 0 : i32
    return %c0_i32, %c0_i32_0 : i32, i32
  }
  func.func @transform_2(%arg0: i32, %arg1: i32) -> (i32, i32) {
    %c0_i32 = arith.constant 0 : i32
    %c0_i32_0 = arith.constant 0 : i32
    %c0_i32_1 = arith.constant 0 : i32
    return %c0_i32, %c0_i32_0 : i32, i32
  }
  func.func @transform_3(%arg0: i32, %arg1: i32) -> (i32, i32) {
    %c0_i32 = arith.constant 0 : i32
    %c0_i32_0 = arith.constant 0 : i32
    return %c0_i32, %arg1 : i32, i32
  }
  func.func @transform_4(%arg0: i32, %arg1: i32) -> (i32, i32) {
    %c0_i32 = arith.constant 0 : i32
    %c0_i32_0 = arith.constant 0 : i32
    return %c0_i32, %arg1 : i32, i32
  }
  func.func @transform_5(%arg0: i32, %arg1: i32) -> (i32, i32) {
    %c0_i32 = arith.constant 0 : i32
    return %arg0, %arg1 : i32, i32
  }
}

module attributes {stable_mosaic.version = 11 : i64} {
  func.func @_ln_matmul_kernel(%arg0: i32, %arg1: i32, %arg2: memref<16x32xf32, #tpu.memory_space<vmem>>, %arg3: memref<1x32xf32, #tpu.memory_space<vmem>>, %arg4: memref<1x32xf32, #tpu.memory_space<vmem>>, %arg5: memref<32x128xbf16, #tpu.memory_space<vmem>>, %arg6: memref<1x128xf32, #tpu.memory_space<vmem>>, %arg7: memref<16x128xbf16, #tpu.memory_space<vmem>>, %arg8: memref<16x32xbf16, #tpu.memory_space<vmem>>) attributes {dimension_semantics = [#tpu.dimension_semantics<parallel>, #tpu.dimension_semantics<arbitrary>], iteration_bounds = array<i64: 1, 1>, scalar_prefetch = 0 : i64, scratch_operands = 1 : i64, tpu.core_type = #tpu.core_type<tc>, window_params = [{transform_indices = @transform_0, window_bounds = array<i64: 16, 32>}, {pipeline_mode = #tpu.pipeline_mode<synchronous>, transform_indices = @transform_1, window_bounds = array<i64: 1, 32>}, {pipeline_mode = #tpu.pipeline_mode<synchronous>, transform_indices = @transform_2, window_bounds = array<i64: 1, 32>}, {transform_indices = @transform_3, window_bounds = array<i64: 32, 128>}, {transform_indices = @transform_4, window_bounds = array<i64: 1, 128>}, {transform_indices = @transform_5, window_bounds = array<i64: 16, 128>}]} {
    %c0_i32 = arith.constant 0 : i32
    %0 = arith.cmpi eq, %arg1, %c0_i32 : i32
    %1 = arith.extui %0 : i1 to i32
    %c0_i32_0 = arith.constant 0 : i32
    %2 = arith.cmpi ne, %1, %c0_i32_0 : i32
    scf.if %2 {
      %c0_11 = arith.constant 0 : index
      %c0_12 = arith.constant 0 : index
      %19 = vector.load %arg2[%c0_11, %c0_12] : memref<16x32xf32, #tpu.memory_space<vmem>>, vector<16x32xf32>
      %cst_13 = arith.constant dense<0.000000e+00> : vector<16xf32>
      %20 = vector.multi_reduction <add>, %19, %cst_13 [1] : vector<16x32xf32> to vector<16xf32>
      %21 = vector.shape_cast %20 : vector<16xf32> to vector<16x1xf32>
      %cst_14 = arith.constant 3.200000e+01 : f32
      %22 = vector.broadcast %cst_14 : f32 to vector<16x1xf32>
      %23 = arith.divf %21, %22 : vector<16x1xf32>
      %24 = vector.broadcast %23 : vector<16x1xf32> to vector<16x32xf32>
      %25 = arith.subf %19, %24 : vector<16x32xf32>
      %26 = arith.mulf %25, %25 : vector<16x32xf32>
      %cst_15 = arith.constant dense<0.000000e+00> : vector<16xf32>
      %27 = vector.multi_reduction <add>, %26, %cst_15 [1] : vector<16x32xf32> to vector<16xf32>
      %28 = vector.shape_cast %27 : vector<16xf32> to vector<16x1xf32>
      %cst_16 = arith.constant 3.200000e+01 : f32
      %29 = vector.broadcast %cst_16 : f32 to vector<16x1xf32>
      %30 = arith.divf %28, %29 : vector<16x1xf32>
      %31 = vector.broadcast %23 : vector<16x1xf32> to vector<16x32xf32>
      %32 = arith.subf %19, %31 : vector<16x32xf32>
      %cst_17 = arith.constant 9.99999974E-6 : f32
      %33 = vector.broadcast %cst_17 : f32 to vector<16x1xf32>
      %34 = arith.addf %30, %33 : vector<16x1xf32>
      %35 = math.rsqrt %34 : vector<16x1xf32>
      %36 = vector.broadcast %35 : vector<16x1xf32> to vector<16x32xf32>
      %37 = arith.mulf %32, %36 : vector<16x32xf32>
      %c0_18 = arith.constant 0 : index
      %c0_19 = arith.constant 0 : index
      %38 = vector.load %arg3[%c0_18, %c0_19] : memref<1x32xf32, #tpu.memory_space<vmem>>, vector<1x32xf32>
      %39 = vector.broadcast %38 : vector<1x32xf32> to vector<16x32xf32>
      %40 = arith.mulf %37, %39 : vector<16x32xf32>
      %c0_20 = arith.constant 0 : index
      %c0_21 = arith.constant 0 : index
      %41 = vector.load %arg4[%c0_20, %c0_21] : memref<1x32xf32, #tpu.memory_space<vmem>>, vector<1x32xf32>
      %42 = vector.broadcast %41 : vector<1x32xf32> to vector<16x32xf32>
      %43 = arith.addf %40, %42 : vector<16x32xf32>
      %44 = arith.truncf %43 : vector<16x32xf32> to vector<16x32xbf16>
      %c0_22 = arith.constant 0 : index
      %c0_23 = arith.constant 0 : index
      %45 = vector.load %arg8[%c0_22, %c0_23] : memref<16x32xbf16, #tpu.memory_space<vmem>>, vector<16x32xbf16>
      tpu.vector_store %arg8[%c0_22, %c0_23], %44 {strides = array<i32>} : memref<16x32xbf16, #tpu.memory_space<vmem>>, vector<16x32xbf16>,
    } else {
    }
    %c0 = arith.constant 0 : index
    %c0_1 = arith.constant 0 : index
    %3 = vector.load %arg8[%c0, %c0_1] : memref<16x32xbf16, #tpu.memory_space<vmem>>, vector<16x32xbf16>
    %c0_2 = arith.constant 0 : index
    %c0_3 = arith.constant 0 : index
    %4 = vector.load %arg5[%c0_2, %c0_3] : memref<32x128xbf16, #tpu.memory_space<vmem>>, vector<32x128xbf16>
    %cst = arith.constant dense<0.000000e+00> : vector<16x128xf32>
    %5 = tpu.matmul %3, %4, %cst {dimension_numbers = #tpu.dot_dimension_numbers<[1], [0], [0], [1], [0, 0, 1, 1], [], []>} : vector<16x32xbf16>, vector<32x128xbf16>, vector<16x128xf32> -> vector<16x128xf32>
    %c0_4 = arith.constant 0 : index
    %c0_5 = arith.constant 0 : index
    %6 = vector.load %arg6[%c0_4, %c0_5] : memref<1x128xf32, #tpu.memory_space<vmem>>, vector<1x128xf32>
    %7 = vector.broadcast %6 : vector<1x128xf32> to vector<16x128xf32>
    %8 = arith.addf %5, %7 : vector<16x128xf32>
    %cst_6 = arith.constant 5.000000e-01 : f32
    %9 = vector.broadcast %cst_6 : f32 to vector<16x128xf32>
    %10 = arith.mulf %9, %8 : vector<16x128xf32>
    %cst_7 = arith.constant 0.707106769 : f32
    %11 = vector.broadcast %cst_7 : f32 to vector<16x128xf32>
    %12 = arith.mulf %8, %11 : vector<16x128xf32>
    %13 = math.erf %12 : vector<16x128xf32>
    %cst_8 = arith.constant 1.000000e+00 : f32
    %14 = vector.broadcast %cst_8 : f32 to vector<16x128xf32>
    %15 = arith.addf %14, %13 : vector<16x128xf32>
    %16 = arith.mulf %10, %15 : vector<16x128xf32>
    %17 = arith.truncf %16 : vector<16x128xf32> to vector<16x128xbf16>
    %c0_9 = arith.constant 0 : index
    %c0_10 = arith.constant 0 : index
    %18 = vector.load %arg7[%c0_9, %c0_10] : memref<16x128xbf16, #tpu.memory_space<vmem>>, vector<16x128xbf16>
    tpu.vector_store %arg7[%c0_9, %c0_10], %17 {strides = array<i32>} : memref<16x128xbf16, #tpu.memory_space<vmem>>, vector<16x128xbf16>,
    return
  }
  func.func @transform_0(%arg0: i32, %arg1: i32) -> (i32, i32) {
    %c0_i32 = arith.constant 0 : i32
    %c0_i32_0 = arith.constant 0 : i32
    return %arg0, %c0_i32 : i32, i32
  }
  func.func @transform_1(%arg0: i32, %arg1: i32) -> (i32, i32) {
    %c0_i32 = arith.constant 0 : i32
    %c0_i32_0 = arith.constant 0 : i32
    %c0_i32_1 = arith.constant 0 : i32
    return %c0_i32, %c0_i32_0 : i32, i32
  }
  func.func @transform_2(%arg0: i32, %arg1: i32) -> (i32, i32) {
    %c0_i32 = arith.constant 0 : i32
    %c0_i32_0 = arith.constant 0 : i32
    %c0_i32_1 = arith.constant 0 : i32
    return %c0_i32, %c0_i32_0 : i32, i32
  }
  func.func @transform_3(%arg0: i32, %arg1: i32) -> (i32, i32) {
    %c0_i32 = arith.constant 0 : i32
    %c0_i32_0 = arith.constant 0 : i32
    return %c0_i32, %arg1 : i32, i32
  }
  func.func @transform_4(%arg0: i32, %arg1: i32) -> (i32, i32) {
    %c0_i32 = arith.constant 0 : i32
    %c0_i32_0 = arith.constant 0 : i32
    return %c0_i32, %arg1 : i32, i32
  }
  func.func @transform_5(%arg0: i32, %arg1: i32) -> (i32, i32) {
    %c0_i32 = arith.constant 0 : i32
    return %arg0, %arg1 : i32, i32
  }
}

module attributes {stable_mosaic.version = 11 : i64} {
  func.func @_linear_residual_single_kernel(%arg0: i32, %arg1: i32, %arg2: memref<16x32xbf16, #tpu.memory_space<vmem>>, %arg3: memref<32x32xbf16, #tpu.memory_space<vmem>>, %arg4: memref<1x32xf32, #tpu.memory_space<vmem>>, %arg5: memref<16x32xf32, #tpu.memory_space<vmem>>, %arg6: memref<16x32xf32, #tpu.memory_space<vmem>>) attributes {dimension_semantics = [#tpu.dimension_semantics<parallel>, #tpu.dimension_semantics<parallel>], iteration_bounds = array<i64: 1, 1>, scalar_prefetch = 0 : i64, scratch_operands = 0 : i64, tpu.core_type = #tpu.core_type<tc>, window_params = [{transform_indices = @transform_0, window_bounds = array<i64: 16, 32>}, {transform_indices = @transform_1, window_bounds = array<i64: 32, 32>}, {transform_indices = @transform_2, window_bounds = array<i64: 1, 32>}, {transform_indices = @transform_3, window_bounds = array<i64: 16, 32>}, {transform_indices = @transform_4, window_bounds = array<i64: 16, 32>}]} {
    %c0 = arith.constant 0 : index
    %c0_0 = arith.constant 0 : index
    %0 = vector.load %arg2[%c0, %c0_0] : memref<16x32xbf16, #tpu.memory_space<vmem>>, vector<16x32xbf16>
    %c0_1 = arith.constant 0 : index
    %c0_2 = arith.constant 0 : index
    %1 = vector.load %arg3[%c0_1, %c0_2] : memref<32x32xbf16, #tpu.memory_space<vmem>>, vector<32x32xbf16>
    %cst = arith.constant dense<0.000000e+00> : vector<16x32xf32>
    %2 = tpu.matmul %0, %1, %cst {dimension_numbers = #tpu.dot_dimension_numbers<[1], [0], [0], [1], [0, 0, 1, 1], [], []>} : vector<16x32xbf16>, vector<32x32xbf16>, vector<16x32xf32> -> vector<16x32xf32>
    %c0_3 = arith.constant 0 : index
    %c0_4 = arith.constant 0 : index
    %3 = vector.load %arg4[%c0_3, %c0_4] : memref<1x32xf32, #tpu.memory_space<vmem>>, vector<1x32xf32>
    %4 = vector.broadcast %3 : vector<1x32xf32> to vector<16x32xf32>
    %5 = arith.addf %2, %4 : vector<16x32xf32>
    %c0_5 = arith.constant 0 : index
    %c0_6 = arith.constant 0 : index
    %6 = vector.load %arg5[%c0_5, %c0_6] : memref<16x32xf32, #tpu.memory_space<vmem>>, vector<16x32xf32>
    %7 = arith.addf %5, %6 : vector<16x32xf32>
    %c0_7 = arith.constant 0 : index
    %c0_8 = arith.constant 0 : index
    %8 = vector.load %arg6[%c0_7, %c0_8] : memref<16x32xf32, #tpu.memory_space<vmem>>, vector<16x32xf32>
    tpu.vector_store %arg6[%c0_7, %c0_8], %7 {strides = array<i32>} : memref<16x32xf32, #tpu.memory_space<vmem>>, vector<16x32xf32>,
    return
  }
  func.func @transform_0(%arg0: i32, %arg1: i32) -> (i32, i32) {
    %c0_i32 = arith.constant 0 : i32
    %c0_i32_0 = arith.constant 0 : i32
    return %arg0, %c0_i32 : i32, i32
  }
  func.func @transform_1(%arg0: i32, %arg1: i32) -> (i32, i32) {
    %c0_i32 = arith.constant 0 : i32
    %c0_i32_0 = arith.constant 0 : i32
    return %c0_i32, %arg1 : i32, i32
  }
  func.func @transform_2(%arg0: i32, %arg1: i32) -> (i32, i32) {
    %c0_i32 = arith.constant 0 : i32
    %c0_i32_0 = arith.constant 0 : i32
    return %c0_i32, %arg1 : i32, i32
  }
  func.func @transform_3(%arg0: i32, %arg1: i32) -> (i32, i32) {
    %c0_i32 = arith.constant 0 : i32
    return %arg0, %arg1 : i32, i32
  }
  func.func @transform_4(%arg0: i32, %arg1: i32) -> (i32, i32) {
    %c0_i32 = arith.constant 0 : i32
    return %arg0, %arg1 : i32, i32
  }
}

module attributes {stable_mosaic.version = 11 : i64} {
  func.func @_ln_matmul_kernel(%arg0: i32, %arg1: i32, %arg2: memref<16x32xf32, #tpu.memory_space<vmem>>, %arg3: memref<1x32xf32, #tpu.memory_space<vmem>>, %arg4: memref<1x32xf32, #tpu.memory_space<vmem>>, %arg5: memref<32x96xbf16, #tpu.memory_space<vmem>>, %arg6: memref<1x96xf32, #tpu.memory_space<vmem>>, %arg7: memref<16x96xbf16, #tpu.memory_space<vmem>>, %arg8: memref<16x32xbf16, #tpu.memory_space<vmem>>) attributes {dimension_semantics = [#tpu.dimension_semantics<parallel>, #tpu.dimension_semantics<arbitrary>], iteration_bounds = array<i64: 1, 1>, scalar_prefetch = 0 : i64, scratch_operands = 1 : i64, tpu.core_type = #tpu.core_type<tc>, window_params = [{transform_indices = @transform_0, window_bounds = array<i64: 16, 32>}, {pipeline_mode = #tpu.pipeline_mode<synchronous>, transform_indices = @transform_1, window_bounds = array<i64: 1, 32>}, {pipeline_mode = #tpu.pipeline_mode<synchronous>, transform_indices = @transform_2, window_bounds = array<i64: 1, 32>}, {transform_indices = @transform_3, window_bounds = array<i64: 32, 96>}, {transform_indices = @transform_4, window_bounds = array<i64: 1, 96>}, {transform_indices = @transform_5, window_bounds = array<i64: 16, 96>}]} {
    %c0_i32 = arith.constant 0 : i32
    %0 = arith.cmpi eq, %arg1, %c0_i32 : i32
    %1 = arith.extui %0 : i1 to i32
    %c0_i32_0 = arith.constant 0 : i32
    %2 = arith.cmpi ne, %1, %c0_i32_0 : i32
    scf.if %2 {
      %c0_8 = arith.constant 0 : index
      %c0_9 = arith.constant 0 : index
      %11 = vector.load %arg2[%c0_8, %c0_9] : memref<16x32xf32, #tpu.memory_space<vmem>>, vector<16x32xf32>
      %cst_10 = arith.constant dense<0.000000e+00> : vector<16xf32>
      %12 = vector.multi_reduction <add>, %11, %cst_10 [1] : vector<16x32xf32> to vector<16xf32>
      %13 = vector.shape_cast %12 : vector<16xf32> to vector<16x1xf32>
      %cst_11 = arith.constant 3.200000e+01 : f32
      %14 = vector.broadcast %cst_11 : f32 to vector<16x1xf32>
      %15 = arith.divf %13, %14 : vector<16x1xf32>
      %16 = vector.broadcast %15 : vector<16x1xf32> to vector<16x32xf32>
      %17 = arith.subf %11, %16 : vector<16x32xf32>
      %18 = arith.mulf %17, %17 : vector<16x32xf32>
      %cst_12 = arith.constant dense<0.000000e+00> : vector<16xf32>
      %19 = vector.multi_reduction <add>, %18, %cst_12 [1] : vector<16x32xf32> to vector<16xf32>
      %20 = vector.shape_cast %19 : vector<16xf32> to vector<16x1xf32>
      %cst_13 = arith.constant 3.200000e+01 : f32
      %21 = vector.broadcast %cst_13 : f32 to vector<16x1xf32>
      %22 = arith.divf %20, %21 : vector<16x1xf32>
      %23 = vector.broadcast %15 : vector<16x1xf32> to vector<16x32xf32>
      %24 = arith.subf %11, %23 : vector<16x32xf32>
      %cst_14 = arith.constant 9.99999974E-6 : f32
      %25 = vector.broadcast %cst_14 : f32 to vector<16x1xf32>
      %26 = arith.addf %22, %25 : vector<16x1xf32>
      %27 = math.rsqrt %26 : vector<16x1xf32>
      %28 = vector.broadcast %27 : vector<16x1xf32> to vector<16x32xf32>
      %29 = arith.mulf %24, %28 : vector<16x32xf32>
      %c0_15 = arith.constant 0 : index
      %c0_16 = arith.constant 0 : index
      %30 = vector.load %arg3[%c0_15, %c0_16] : memref<1x32xf32, #tpu.memory_space<vmem>>, vector<1x32xf32>
      %31 = vector.broadcast %30 : vector<1x32xf32> to vector<16x32xf32>
      %32 = arith.mulf %29, %31 : vector<16x32xf32>
      %c0_17 = arith.constant 0 : index
      %c0_18 = arith.constant 0 : index
      %33 = vector.load %arg4[%c0_17, %c0_18] : memref<1x32xf32, #tpu.memory_space<vmem>>, vector<1x32xf32>
      %34 = vector.broadcast %33 : vector<1x32xf32> to vector<16x32xf32>
      %35 = arith.addf %32, %34 : vector<16x32xf32>
      %36 = arith.truncf %35 : vector<16x32xf32> to vector<16x32xbf16>
      %c0_19 = arith.constant 0 : index
      %c0_20 = arith.constant 0 : index
      %37 = vector.load %arg8[%c0_19, %c0_20] : memref<16x32xbf16, #tpu.memory_space<vmem>>, vector<16x32xbf16>
      tpu.vector_store %arg8[%c0_19, %c0_20], %36 {strides = array<i32>} : memref<16x32xbf16, #tpu.memory_space<vmem>>, vector<16x32xbf16>,
    } else {
    }
    %c0 = arith.constant 0 : index
    %c0_1 = arith.constant 0 : index
    %3 = vector.load %arg8[%c0, %c0_1] : memref<16x32xbf16, #tpu.memory_space<vmem>>, vector<16x32xbf16>
    %c0_2 = arith.constant 0 : index
    %c0_3 = arith.constant 0 : index
    %4 = vector.load %arg5[%c0_2, %c0_3] : memref<32x96xbf16, #tpu.memory_space<vmem>>, vector<32x96xbf16>
    %cst = arith.constant dense<0.000000e+00> : vector<16x96xf32>
    %5 = tpu.matmul %3, %4, %cst {dimension_numbers = #tpu.dot_dimension_numbers<[1], [0], [0], [1], [0, 0, 1, 1], [], []>} : vector<16x32xbf16>, vector<32x96xbf16>, vector<16x96xf32> -> vector<16x96xf32>
    %c0_4 = arith.constant 0 : index
    %c0_5 = arith.constant 0 : index
    %6 = vector.load %arg6[%c0_4, %c0_5] : memref<1x96xf32, #tpu.memory_space<vmem>>, vector<1x96xf32>
    %7 = vector.broadcast %6 : vector<1x96xf32> to vector<16x96xf32>
    %8 = arith.addf %5, %7 : vector<16x96xf32>
    %9 = arith.truncf %8 : vector<16x96xf32> to vector<16x96xbf16>
    %c0_6 = arith.constant 0 : index
    %c0_7 = arith.constant 0 : index
    %10 = vector.load %arg7[%c0_6, %c0_7] : memref<16x96xbf16, #tpu.memory_space<vmem>>, vector<16x96xbf16>
    tpu.vector_store %arg7[%c0_6, %c0_7], %9 {strides = array<i32>} : memref<16x96xbf16, #tpu.memory_space<vmem>>, vector<16x96xbf16>,
    return
  }
  func.func @transform_0(%arg0: i32, %arg1: i32) -> (i32, i32) {
    %c0_i32 = arith.constant 0 : i32
    %c0_i32_0 = arith.constant 0 : i32
    return %arg0, %c0_i32 : i32, i32
  }
  func.func @transform_1(%arg0: i32, %arg1: i32) -> (i32, i32) {
    %c0_i32 = arith.constant 0 : i32
    %c0_i32_0 = arith.constant 0 : i32
    %c0_i32_1 = arith.constant 0 : i32
    return %c0_i32, %c0_i32_0 : i32, i32
  }
  func.func @transform_2(%arg0: i32, %arg1: i32) -> (i32, i32) {
    %c0_i32 = arith.constant 0 : i32
    %c0_i32_0 = arith.constant 0 : i32
    %c0_i32_1 = arith.constant 0 : i32
    return %c0_i32, %c0_i32_0 : i32, i32
  }
  func.func @transform_3(%arg0: i32, %arg1: i32) -> (i32, i32) {
    %c0_i32 = arith.constant 0 : i32
    %c0_i32_0 = arith.constant 0 : i32
    return %c0_i32, %arg1 : i32, i32
  }
  func.func @transform_4(%arg0: i32, %arg1: i32) -> (i32, i32) {
    %c0_i32 = arith.constant 0 : i32
    %c0_i32_0 = arith.constant 0 : i32
    return %c0_i32, %arg1 : i32, i32
  }
  func.func @transform_5(%arg0: i32, %arg1: i32) -> (i32, i32) {
    %c0_i32 = arith.constant 0 : i32
    return %arg0, %arg1 : i32, i32
  }
}

module attributes {stable_mosaic.version = 11 : i64} {
  func.func @_linear_residual_single_kernel(%arg0: i32, %arg1: i32, %arg2: memref<16x128xbf16, #tpu.memory_space<vmem>>, %arg3: memref<128x32xbf16, #tpu.memory_space<vmem>>, %arg4: memref<1x32xf32, #tpu.memory_space<vmem>>, %arg5: memref<16x32xf32, #tpu.memory_space<vmem>>, %arg6: memref<16x32xf32, #tpu.memory_space<vmem>>) attributes {dimension_semantics = [#tpu.dimension_semantics<parallel>, #tpu.dimension_semantics<parallel>], iteration_bounds = array<i64: 1, 1>, scalar_prefetch = 0 : i64, scratch_operands = 0 : i64, tpu.core_type = #tpu.core_type<tc>, window_params = [{transform_indices = @transform_0, window_bounds = array<i64: 16, 128>}, {transform_indices = @transform_1, window_bounds = array<i64: 128, 32>}, {transform_indices = @transform_2, window_bounds = array<i64: 1, 32>}, {transform_indices = @transform_3, window_bounds = array<i64: 16, 32>}, {transform_indices = @transform_4, window_bounds = array<i64: 16, 32>}]} {
    %c0 = arith.constant 0 : index
    %c0_0 = arith.constant 0 : index
    %0 = vector.load %arg2[%c0, %c0_0] : memref<16x128xbf16, #tpu.memory_space<vmem>>, vector<16x128xbf16>
    %c0_1 = arith.constant 0 : index
    %c0_2 = arith.constant 0 : index
    %1 = vector.load %arg3[%c0_1, %c0_2] : memref<128x32xbf16, #tpu.memory_space<vmem>>, vector<128x32xbf16>
    %cst = arith.constant dense<0.000000e+00> : vector<16x32xf32>
    %2 = tpu.matmul %0, %1, %cst {dimension_numbers = #tpu.dot_dimension_numbers<[1], [0], [0], [1], [0, 0, 1, 1], [], []>} : vector<16x128xbf16>, vector<128x32xbf16>, vector<16x32xf32> -> vector<16x32xf32>
    %c0_3 = arith.constant 0 : index
    %c0_4 = arith.constant 0 : index
    %3 = vector.load %arg4[%c0_3, %c0_4] : memref<1x32xf32, #tpu.memory_space<vmem>>, vector<1x32xf32>
    %4 = vector.broadcast %3 : vector<1x32xf32> to vector<16x32xf32>
    %5 = arith.addf %2, %4 : vector<16x32xf32>
    %c0_5 = arith.constant 0 : index
    %c0_6 = arith.constant 0 : index
    %6 = vector.load %arg5[%c0_5, %c0_6] : memref<16x32xf32, #tpu.memory_space<vmem>>, vector<16x32xf32>
    %7 = arith.addf %5, %6 : vector<16x32xf32>
    %c0_7 = arith.constant 0 : index
    %c0_8 = arith.constant 0 : index
    %8 = vector.load %arg6[%c0_7, %c0_8] : memref<16x32xf32, #tpu.memory_space<vmem>>, vector<16x32xf32>
    tpu.vector_store %arg6[%c0_7, %c0_8], %7 {strides = array<i32>} : memref<16x32xf32, #tpu.memory_space<vmem>>, vector<16x32xf32>,
    return
  }
  func.func @transform_0(%arg0: i32, %arg1: i32) -> (i32, i32) {
    %c0_i32 = arith.constant 0 : i32
    %c0_i32_0 = arith.constant 0 : i32
    return %arg0, %c0_i32 : i32, i32
  }
  func.func @transform_1(%arg0: i32, %arg1: i32) -> (i32, i32) {
    %c0_i32 = arith.constant 0 : i32
    %c0_i32_0 = arith.constant 0 : i32
    return %c0_i32, %arg1 : i32, i32
  }
  func.func @transform_2(%arg0: i32, %arg1: i32) -> (i32, i32) {
    %c0_i32 = arith.constant 0 : i32
    %c0_i32_0 = arith.constant 0 : i32
    return %c0_i32, %arg1 : i32, i32
  }
  func.func @transform_3(%arg0: i32, %arg1: i32) -> (i32, i32) {
    %c0_i32 = arith.constant 0 : i32
    return %arg0, %arg1 : i32, i32
  }
  func.func @transform_4(%arg0: i32, %arg1: i32) -> (i32, i32) {
    %c0_i32 = arith.constant 0 : i32
    return %arg0, %arg1 : i32, i32
  }
}

module attributes {stable_mosaic.version = 11 : i64} {
  func.func @_linear_residual_single_kernel(%arg0: i32, %arg1: i32, %arg2: memref<16x128xbf16, #tpu.memory_space<vmem>>, %arg3: memref<128x32xbf16, #tpu.memory_space<vmem>>, %arg4: memref<1x32xf32, #tpu.memory_space<vmem>>, %arg5: memref<16x32xf32, #tpu.memory_space<vmem>>, %arg6: memref<16x32xf32, #tpu.memory_space<vmem>>) attributes {dimension_semantics = [#tpu.dimension_semantics<parallel>, #tpu.dimension_semantics<parallel>], iteration_bounds = array<i64: 1, 1>, scalar_prefetch = 0 : i64, scratch_operands = 0 : i64, tpu.core_type = #tpu.core_type<tc>, window_params = [{transform_indices = @transform_0, window_bounds = array<i64: 16, 128>}, {transform_indices = @transform_1, window_bounds = array<i64: 128, 32>}, {transform_indices = @transform_2, window_bounds = array<i64: 1, 32>}, {transform_indices = @transform_3, window_bounds = array<i64: 16, 32>}, {transform_indices = @transform_4, window_bounds = array<i64: 16, 32>}]} {
    %c0 = arith.constant 0 : index
    %c0_0 = arith.constant 0 : index
    %0 = vector.load %arg2[%c0, %c0_0] : memref<16x128xbf16, #tpu.memory_space<vmem>>, vector<16x128xbf16>
    %c0_1 = arith.constant 0 : index
    %c0_2 = arith.constant 0 : index
    %1 = vector.load %arg3[%c0_1, %c0_2] : memref<128x32xbf16, #tpu.memory_space<vmem>>, vector<128x32xbf16>
    %cst = arith.constant dense<0.000000e+00> : vector<16x32xf32>
    %2 = tpu.matmul %0, %1, %cst {dimension_numbers = #tpu.dot_dimension_numbers<[1], [0], [0], [1], [0, 0, 1, 1], [], []>} : vector<16x128xbf16>, vector<128x32xbf16>, vector<16x32xf32> -> vector<16x32xf32>
    %c0_3 = arith.constant 0 : index
    %c0_4 = arith.constant 0 : index
    %3 = vector.load %arg4[%c0_3, %c0_4] : memref<1x32xf32, #tpu.memory_space<vmem>>, vector<1x32xf32>
    %4 = vector.broadcast %3 : vector<1x32xf32> to vector<16x32xf32>
    %5 = arith.addf %2, %4 : vector<16x32xf32>
    %c0_5 = arith.constant 0 : index
    %c0_6 = arith.constant 0 : index
    %6 = vector.load %arg5[%c0_5, %c0_6] : memref<16x32xf32, #tpu.memory_space<vmem>>, vector<16x32xf32>
    %7 = arith.addf %5, %6 : vector<16x32xf32>
    %c0_7 = arith.constant 0 : index
    %c0_8 = arith.constant 0 : index
    %8 = vector.load %arg6[%c0_7, %c0_8] : memref<16x32xf32, #tpu.memory_space<vmem>>, vector<16x32xf32>
    tpu.vector_store %arg6[%c0_7, %c0_8], %7 {strides = array<i32>} : memref<16x32xf32, #tpu.memory_space<vmem>>, vector<16x32xf32>,
    return
  }
  func.func @transform_0(%arg0: i32, %arg1: i32) -> (i32, i32) {
    %c0_i32 = arith.constant 0 : i32
    %c0_i32_0 = arith.constant 0 : i32
    return %arg0, %c0_i32 : i32, i32
  }
  func.func @transform_1(%arg0: i32, %arg1: i32) -> (i32, i32) {
    %c0_i32 = arith.constant 0 : i32
    %c0_i32_0 = arith.constant 0 : i32
    return %c0_i32, %arg1 : i32, i32
  }
  func.func @transform_2(%arg0: i32, %arg1: i32) -> (i32, i32) {
    %c0_i32 = arith.constant 0 : i32
    %c0_i32_0 = arith.constant 0 : i32
    return %c0_i32, %arg1 : i32, i32
  }
  func.func @transform_3(%arg0: i32, %arg1: i32) -> (i32, i32) {
    %c0_i32 = arith.constant 0 : i32
    return %arg0, %arg1 : i32, i32
  }
  func.func @transform_4(%arg0: i32, %arg1: i32) -> (i32, i32) {
    %c0_i32 = arith.constant 0 : i32
    return %arg0, %arg1 : i32, i32
  }
}

</mosaic_0001>

<bundles_post_ra>
// kernel: test_model_forward.12
= control target key start
LH: loop header
LB: loop body
LE: loop exit
PB: predicated region body
PF: predicated region fallthrough
CT: control target
= control target key end

     0   :  { %v124_v0 = vmov 0.0   ;;  %vm125_vm0 = vmmov 0   ;;  %vm48_vm1 = vcmask 261120   ;;  %s178_s1 = inlined_call_operand.vmem [shape: bf16[32,32], index: 1, kind: input, shape index: {}]   ;;  %s179_s0 = inlined_call_operand.vmem [shape: bf16[16,32], index: 0, kind: input, shape index: {}]   ;;  %s180_s2 = inlined_call_operand.vmem [shape: f32[1,32], index: 2, kind: input, shape index: {}]   ;;  %s181_s3 = inlined_call_operand.vmem [shape: f32[16,32], index: 3, kind: input, shape index: {}]   ;;  %s182_s4 = inlined_call_operand.vmem [shape: f32[16,32], index: 4, kind: output, shape index: {}]  }
   0x1   :  { %111 = vmatprep.subr.bf16.mxu0 %v124_v0  ;;  %v121_v1 = vld [vmem:[%s178_s1 + $0x8] sm:$0xff]   ;;  %115 = vmatprep.mubr.msk.bf16.mxu0 %vm125_vm0, %v124_v0  ;;  %v122_v2 = vld [vmem:[%s178_s1] sm:$0xff]  }
   0x2   :  { %112 = vmatpush3.bf16.msra.mxu0 %v121_v1  ;;  %v123_v3 = vld [vmem:[%s179_s0] sm:$0xff]   ;;  %v94_v11 = vld [vmem:[%s181_s3 + $0x8] sm:$0xff] }
   0x3   :  { %113 = vmatprep.subr.bf16.mxu0 %v124_v0  ;;  %v103_v4 = vld [vmem:[%s180_s2] ss:$0 sm:$0xff] }
   0x4   :  { %v93_v6 = vld [vmem:[%s181_s3] sm:$0xff] }
   0x6   :  { %114 = vmatpush3.bf16.msra.mxu0 %v122_v2 }
   0x9   :  { %116 = vmatmul.mubr.msk.bf16.vlgmr.msra.gmra.mxu0 %vm48_vm1, %v123_v3 }
  0xc9   :  { %v86_v5 = vpop.f32.mrf.mxu0 }
  0xca   :  { %v87_v7 = vadd.f32 %v103_v4, %v86_v5 }
  0xcb   :  { %v117_v8 = vpop.f32.mrf.mxu0 }
  0xcc   :  { %v95_v9 = vadd.f32 %v93_v6, %v87_v7 }
  0xcd   :  { %v89_v10 = vpop.f32.mrf.mxu0 }
  0xce   :  { %97 = vst.msk [vmem:[%s182_s4] sm:$0xff] %vm48_vm1, %v95_v9  ;;  %v90_v12 = vadd.f32 %v103_v4, %v89_v10 }
  0xcf   :  { %v118_v13 = vpop.f32.mrf.mxu0 }
  0xd0   :  { %v96_v14 = vadd.f32 %v94_v11, %v90_v12 }
  0xd2   :  { %98 = vst.msk [vmem:[%s182_s4 + $0x8] sm:$0xff] %vm48_vm1, %v96_v14 }

// kernel: test_model_forward.10
= control target key start
LH: loop header
LB: loop body
LE: loop exit
PB: predicated region body
PF: predicated region fallthrough
CT: control target
= control target key end

     0   :  { %10 = vsyncpa [#allocation4], 0  ;;  %s353_s0 = inlined_call_operand.hbm [shape: f32[16,32], index: 0, kind: input, shape index: {}]   ;;  %s354_s1 = inlined_call_operand.vmem [shape: f32[1,32], index: 1, kind: input, shape index: {}]   ;;  %s355_s2 = inlined_call_operand.vmem [shape: f32[1,32], index: 2, kind: input, shape index: {}]   ;;  %s356_s3 = inlined_call_operand.hbm [shape: bf16[32,96], index: 3, kind: input, shape index: {}]   ;;  %s357_s4 = inlined_call_operand.vmem [shape: f32[1,96], index: 4, kind: input, shape index: {}]   ;;  %s358_s5 = inlined_call_operand.vmem [shape: bf16[16,96], index: 5, kind: output, shape index: {}]  }
   0x1   :  { %11 = vsyncpa [#allocation6], 0  ;;  %s289_s18 = smov [#allocation3]  }
   0x2   :  { %s17_s19 = sshll.u32 %s289_s18, 4  ;;  %s18_s19 = int_to_ptr.vmem [resolvable:$true] %s17_s19 }
   0x3   :  { %s253_s20 = scalar_lea.vmem %s18_s19, 256  ;;  %p258_p1 = scmp.lt.s32.totalorder %s18_s19, %s18_s19 }
   0x4   :  { %p254_p0 = scmp.ne.s32.totalorder %s18_s19, %s253_s20  ;;  %p259_p2 = scmp.lt.s32.totalorder %s253_s20, %s253_s20 }
   0x6   :  { %p260_p3 = por %p259_p2, %p258_p1 }
   0x8   :  { %p261_p4 = pnand %p260_p3, %p254_p0 }
   0xa   :  { %264 = shalt.err (!%p261_p4)
}
   0xb   :  { %s290_s21 = smov 128   ;;  %s291_s22 = smov 8  }
   0xc   :  { %23 = dma.hbm_to_vmem [thread:$0]  %s353_s0, 256, %s18_s19, [#allocation4], %s290_s21, %s290_s21, %s291_s22  }
   0xd   :  { %s292_s25 = smov [#allocation5]  }
   0xe   :  { %s33_s26 = sshll.u32 %s292_s25, 4  ;;  %s34_s26 = int_to_ptr.vmem [resolvable:$true] %s33_s26 }
   0xf   :  { %s273_s27 = scalar_lea.vmem %s34_s26, 256  ;;  %p278_p6 = scmp.lt.s32.totalorder %s34_s26, %s34_s26 }
  0x10   :  { %p274_p5 = scmp.ne.s32.totalorder %s34_s26, %s273_s27  ;;  %p279_p7 = scmp.lt.s32.totalorder %s273_s27, %s273_s27 }
  0x12   :  { %p280_p8 = por %p279_p7, %p278_p6 }
  0x14   :  { %p281_p9 = pnand %p280_p8, %p274_p5 }
  0x16   :  { %284 = shalt.err (!%p281_p9)
}
  0x17   :  { %s293_s28 = smov 64   ;;  %s294_s29 = smov 4  }
  0x18   :  { %39 = dma.hbm_to_vmem [thread:$0]  %s356_s3, 256, %s34_s26, [#allocation6], %s293_s28, %s293_s28, %s294_s29  }
  0x19   :  { %285 = dma.done.wait [#allocation4], 256  }
  0x1a   :  { %286 = vsyncadd [#allocation4], 4294967040 }
  0x1b   :  { %287 = dma.done.wait [#allocation6], 256  }
  0x1c   :  { %288 = vsyncadd [#allocation6], 4294967040  ;;  %vm55_vm0 = vcmask 261120   ;;  %v53_v0 = vld [vmem:[#allocation3] sm:$0xff]  ;;  %v54_v1 = vld [vmem:[#allocation3 + $0x8] sm:$0xff]  ;;  %v295_v15 = vmov 0.0  }
  0x1d   :  { %v56_v2 = vsel %vm55_vm0, %v53_v0, 0.0  ;;  %v59_v3 = vsel %vm55_vm0, %v54_v1, 0.0  ;;  %v238_v14 = vld [vmem:[#allocation5 + $0x8] sm:$0xff]   ;;  %222 = vmatprep.subr.bf16.mxu0 %v295_v15  ;;  %vm296_vm1 = vmmov 0   ;;  %v239_v16 = vld [vmem:[#allocation5] sm:$0xff]   ;;  %vm109_vm2 = vcmask 257024  }
  0x1e   :  { %57 = vadd.xlane.f32.xlu0 %v56_v2  ;;  %226 = vmatprep.mubr.msk.bf16.mxu0 %vm296_vm1, %v295_v15  ;;  %v204_v24 = vld [vmem:[%s354_s1] ss:$0 sm:$0xff]  ;;  %vm195_vm3 = vcmask 781312  }
  0x1f   :  { %223 = vmatpush3.bf16.msra.mxu0 %v238_v14  ;;  %v205_v26 = vld [vmem:[%s355_s2] ss:$0 sm:$0xff] }
  0x20   :  { %224 = vmatprep.subr.bf16.mxu0 %v295_v15  ;;  %v208_v36 = vld [vmem:[%s357_s4] ss:$0 sm:$0xff] }
  0x22   :  { %60 = vadd.xlane.f32.xlu0 %v59_v3 }
  0x23   :  { %225 = vmatpush3.bf16.msra.mxu0 %v239_v16 }
  0xa7   :  { %v58_v4 = vpop.xlane.xlu0 %57 }
  0xa8   :  { %v63_v5 = vmul.f32 0.03125, %v58_v4 }
  0xaa   :  { %v65_v6 = vsub.f32 %v53_v0, %v63_v5 }
  0xab   :  { %v61_v7 = vpop.xlane.xlu0 %60 }
  0xac   :  { %v64_v8 = vmul.f32 0.03125, %v61_v7  ;;  %v67_v9 = vmul.f32 %v65_v6, %v65_v6 }
  0xae   :  { %v66_v10 = vsub.f32 %v54_v1, %v64_v8  ;;  %v69_v11 = vsel %vm55_vm0, %v67_v9, 0.0 }
  0xaf   :  { %70 = vadd.xlane.f32.xlu1 %v69_v11 }
  0xb0   :  { %v68_v12 = vmul.f32 %v66_v10, %v66_v10 }
  0xb2   :  { %v72_v13 = vsel %vm55_vm0, %v68_v12, 0.0 }
  0xb3   :  { %73 = vadd.xlane.f32.xlu1 %v72_v13 }
 0x138   :  { %v71_v17 = vpop.xlane.xlu1 %70 }
 0x139   :  { %v75_v18 = vmul.f32 0.03125, %v71_v17 }
 0x13b   :  { %v77_v19 = vadd.f32 1e-05, %v75_v18 }
 0x13c   :  { %v74_v20 = vpop.xlane.xlu1 %73 }
 0x13d   :  { %241 = vrsqrt.f32 %v77_v19  ;;  %v76_v21 = vmul.f32 0.03125, %v74_v20 }
 0x13f   :  { %v78_v22 = vadd.f32 1e-05, %v76_v21 }
 0x141   :  { %243 = vrsqrt.f32 %v78_v22 }
 0x14a   :  { %v242_v23 = vpop.eup %241 }
 0x14b   :  { %v81_v25 = vmul.f32 %v242_v23, %v65_v6 }
 0x14d   :  { %v90_v27 = vmul.f32 %v204_v24, %v81_v25 }
 0x14e   :  { %v244_v28 = vpop.eup %243 }
 0x14f   :  { %v99_v29 = vadd.f32 %v205_v26, %v90_v27  ;;  %v82_v30 = vmul.f32 %v244_v28, %v66_v10 }
 0x151   :  { %v215_v31 = vpack.c.bf16 %v99_v29, %v99_v29  ;;  %v91_v32 = vmul.f32 %v204_v24, %v82_v30 }
 0x153   :  { %110 = vst.msk [vmem:[#allocation2] sm:$0xf] %vm109_vm2, %v215_v31  ;;  %v100_v33 = vadd.f32 %v205_v26, %v91_v32 }
 0x155   :  { %v216_v34 = vpack.c.bf16 %v100_v33, %v100_v33 }
 0x157   :  { %111 = vst.msk [vmem:[#allocation2 + $0x4] sm:$0xf] %vm109_vm2, %v216_v34 }
 0x15e   :  { %v240_v35 = vld [vmem:[#allocation2] sm:$0xff]  }
 0x15f   :  { %227 = vmatmul.mubr.msk.bf16.vlgmr.msra.gmra.mxu0 %vm55_vm0, %v240_v35 }
 0x21f   :  { %v180_v37 = vpop.f32.mrf.mxu0 }
 0x220   :  { %v181_v38 = vadd.f32 %v208_v36, %v180_v37 }
 0x221   :  { %v228_v39 = vpop.f32.mrf.mxu0 }
 0x222   :  { %v217_v40 = vpack.c.bf16 %v181_v38, %v181_v38 }
 0x223   :  { %v183_v41 = vpop.f32.mrf.mxu0 }
 0x224   :  { %196 = vst.msk [vmem:[%s358_s5] sm:$0xf] %vm195_vm3, %v217_v40  ;;  %v184_v42 = vadd.f32 %v208_v36, %v183_v41 }
 0x225   :  { %v229_v43 = vpop.f32.mrf.mxu0 }
 0x226   :  { %v218_v44 = vpack.c.bf16 %v184_v42, %v184_v42 }
 0x228   :  { %197 = vst.msk [vmem:[%s358_s5 + $0x4] sm:$0xf] %vm195_vm3, %v218_v44 }
 0x229   :  { %202 = vsyncpa [#allocation4], 1 }
 0x22a   :  { %203 = vsyncpa [#allocation6], 1 }

// kernel: test_model_forward.13
= control target key start
LH: loop header
LB: loop body
LE: loop exit
PB: predicated region body
PF: predicated region fallthrough
CT: control target
= control target key end

     0   :  { %vm27_vm0 = vcmask 261120   ;;  %v227_v15 = vmov 0.0   ;;  %vm228_vm1 = vmmov 0   ;;  %vm81_vm2 = vcmask 257024   ;;  %s288_s0 = inlined_call_operand.vmem [shape: f32[16,32], index: 0, kind: input, shape index: {}]   ;;  %s289_s3 = inlined_call_operand.vmem [shape: bf16[32,128], index: 3, kind: input, shape index: {}]   ;;  %s290_s1 = inlined_call_operand.vmem [shape: f32[1,32], index: 1, kind: input, shape index: {}]   ;;  %s291_s2 = inlined_call_operand.vmem [shape: f32[1,32], index: 2, kind: input, shape index: {}]   ;;  %s292_s4 = inlined_call_operand.vmem [shape: f32[1,128], index: 4, kind: input, shape index: {}]   ;;  %s293_s5 = inlined_call_operand.vmem [shape: bf16[16,128], index: 5, kind: output, shape index: {}]  }
   0x1   :  { %v25_v0 = vld [vmem:[%s288_s0] sm:$0xff]  ;;  %v26_v1 = vld [vmem:[%s288_s0 + $0x8] sm:$0xff]  ;;  %206 = vmatprep.subr.bf16.mxu0 %v227_v15  ;;  %210 = vmatprep.mubr.msk.bf16.mxu0 %vm228_vm1, %v227_v15 }
   0x2   :  { %v28_v2 = vsel %vm27_vm0, %v25_v0, 0.0  ;;  %v31_v3 = vsel %vm27_vm0, %v26_v1, 0.0  ;;  %v216_v14 = vld [vmem:[%s289_s3 + $0x8] sm:$0xff]   ;;  %v217_v16 = vld [vmem:[%s289_s3] sm:$0xff]  }
   0x3   :  { %29 = vadd.xlane.f32.xlu0 %v28_v2  ;;  %207 = vmatpush3.bf16.msra.mxu0 %v216_v14  ;;  %v183_v24 = vld [vmem:[%s290_s1] ss:$0 sm:$0xff] }
   0x4   :  { %208 = vmatprep.subr.bf16.mxu0 %v227_v15  ;;  %v184_v26 = vld [vmem:[%s291_s2] ss:$0 sm:$0xff] }
   0x5   :  { %v187_v36 = vld [vmem:[%s292_s4] ss:$0 sm:$0xff] }
   0x7   :  { %32 = vadd.xlane.f32.xlu0 %v31_v3  ;;  %209 = vmatpush3.bf16.msra.mxu0 %v217_v16 }
  0x8c   :  { %v30_v4 = vpop.xlane.xlu0 %29 }
  0x8d   :  { %v35_v5 = vmul.f32 0.03125, %v30_v4 }
  0x8f   :  { %v37_v6 = vsub.f32 %v25_v0, %v35_v5 }
  0x90   :  { %v33_v7 = vpop.xlane.xlu0 %32 }
  0x91   :  { %v36_v8 = vmul.f32 0.03125, %v33_v7  ;;  %v39_v9 = vmul.f32 %v37_v6, %v37_v6 }
  0x93   :  { %v38_v10 = vsub.f32 %v26_v1, %v36_v8  ;;  %v41_v11 = vsel %vm27_vm0, %v39_v9, 0.0 }
  0x94   :  { %42 = vadd.xlane.f32.xlu1 %v41_v11 }
  0x95   :  { %v40_v12 = vmul.f32 %v38_v10, %v38_v10 }
  0x97   :  { %v44_v13 = vsel %vm27_vm0, %v40_v12, 0.0 }
  0x98   :  { %45 = vadd.xlane.f32.xlu1 %v44_v13 }
 0x11d   :  { %v43_v17 = vpop.xlane.xlu1 %42 }
 0x11e   :  { %v47_v18 = vmul.f32 0.03125, %v43_v17 }
 0x120   :  { %v49_v19 = vadd.f32 1e-05, %v47_v18 }
 0x121   :  { %v46_v20 = vpop.xlane.xlu1 %45 }
 0x122   :  { %219 = vrsqrt.f32 %v49_v19  ;;  %v48_v21 = vmul.f32 0.03125, %v46_v20 }
 0x124   :  { %v50_v22 = vadd.f32 1e-05, %v48_v21 }
 0x126   :  { %221 = vrsqrt.f32 %v50_v22 }
 0x12f   :  { %v220_v23 = vpop.eup %219 }
 0x130   :  { %v53_v25 = vmul.f32 %v220_v23, %v37_v6 }
 0x132   :  { %v62_v27 = vmul.f32 %v183_v24, %v53_v25 }
 0x133   :  { %v222_v28 = vpop.eup %221 }
 0x134   :  { %v71_v29 = vadd.f32 %v184_v26, %v62_v27  ;;  %v54_v30 = vmul.f32 %v222_v28, %v38_v10 }
 0x136   :  { %v194_v31 = vpack.c.bf16 %v71_v29, %v71_v29  ;;  %v63_v32 = vmul.f32 %v183_v24, %v54_v30 }
 0x138   :  { %82 = vst.msk [vmem:[#allocation2] sm:$0xf] %vm81_vm2, %v194_v31  ;;  %v72_v33 = vadd.f32 %v184_v26, %v63_v32 }
 0x13a   :  { %v195_v34 = vpack.c.bf16 %v72_v33, %v72_v33 }
 0x13c   :  { %83 = vst.msk [vmem:[#allocation2 + $0x4] sm:$0xf] %vm81_vm2, %v195_v34 }
 0x143   :  { %v218_v35 = vld [vmem:[#allocation2] sm:$0xff]  }
 0x144   :  { %211 = vmatmul.mubr.msk.bf16.vlgmr.msra.gmra.mxu0 %vm27_vm0, %v218_v35 }
 0x204   :  { %v152_v37 = vpop.f32.mrf.mxu0 }
 0x205   :  { %v153_v38 = vadd.f32 %v187_v36, %v152_v37 }
 0x206   :  { %v212_v39 = vpop.f32.mrf.mxu0 }
 0x207   :  { %v161_v40 = vmul.f32 0.70710677, %v153_v38  ;;  %v159_v48 = vmul.f32 0.5, %v153_v38 }
 0x208   :  { %v155_v41 = vpop.f32.mrf.mxu0 }
 0x209   :  { %223 = verf.f32 %v161_v40  ;;  %v156_v42 = vadd.f32 %v187_v36, %v155_v41 }
 0x20a   :  { %v213_v43 = vpop.f32.mrf.mxu0 }
 0x20b   :  { %v162_v44 = vmul.f32 0.70710677, %v156_v42  ;;  %v160_v49 = vmul.f32 0.5, %v156_v42 }
 0x20d   :  { %225 = verf.f32 %v162_v44 }
 0x216   :  { %v224_v45 = vpop.eup %223 }
 0x217   :  { %v165_v46 = vadd.f32 1.0, %v224_v45 }
 0x219   :  { %v167_v51 = vmul.f32 %v165_v46, %v159_v48 }
 0x21a   :  { %v226_v47 = vpop.eup %225 }
 0x21b   :  { %v166_v50 = vadd.f32 1.0, %v226_v47 }
 0x21d   :  { %v168_v52 = vmul.f32 %v166_v50, %v160_v49 }
 0x21f   :  { %v201_v53 = vpack.c.bf16 %v168_v52, %v167_v51 }
 0x221   :  { %202 = vst [vmem:[%s293_s5] sm:$0xff] %v201_v53  }

// kernel: test_model_forward.11
= control target key start
LH: loop header
LB: loop body
LE: loop exit
PB: predicated region body
PF: predicated region fallthrough
CT: control target
= control target key end

     0   :  { %s1224_s6 = smov 0   ;;  %s1226_s7 = smov 0   ;;  %s1418_s0 = inlined_call_operand.vmem [shape: bf16[8,2,1,96], index: 0, kind: input, shape index: {}]   ;;  %s1419_s1 = inlined_call_operand.vmem [shape: bf16[8,2,1,32], index: 1, kind: output, shape index: {}]  }
   0x1   :  { %s1228_s8 = smov 0  }
   0x2 LB: > { %s1025_s9 = sadd.s32 4294967295, %s1195_s8   ;;  %s1241_s10 = sadd.s32 1, %s1195_s8   ;;  %s1195_s8 = sphi %s1228_s8, %s1425_s8   ;;  %s1191_s7 = sphi %s1226_s7, %s1424_s7   ;;  %s1187_s6 = sphi %s1224_s6, %s1423_s6  }
   0x3   : > { %s15_s11 = ssub.s32 %s1195_s8, %s1241_s10  ;;  %s18_s12 = sadd.s32 1, %s1191_s7 }
   0x4   : > { %p16_p0 = scmp.eq.s32.totalorder %s15_s11, 0  ;;  %p25_p1 = scmp.ne.s32.totalorder %s1191_s7, %s1187_s6 }
   0x5   : > { %p26_p2 = scmp.eq.s32.totalorder %s1195_s8, 0  ;;  %p55_p3 = scmp.eq.s32.totalorder %s1025_s9, 1 }
   0x6   : > { %s1252_s13 = scalar_select %p16_p0, %s1191_s7, %s18_s12  }
   0x7   : > { %p27_p4 = por %p26_p2, %p25_p1  ;;  %p1254_p5 = por %p55_p3, %p25_p1 }
   0x8   : > { %p1028_p6 = scmp.ge.s32.totalorder %s1195_s8, 2 }
   0xa   : > { %77 = sbr.rel (%p1028_p6) target bundleno = 23 (0x17), region = 16 }
   0xf   : > { %80 = sbr.rel (!%p27_p4) target bundleno = 23 (0x17), region = 20  ;;  %s82_s15 = sand.u32 (%p27_p4), 1, %s1191_s7  }
  0x10   : > { %s85_s18 = scalar_lea.vmem (%p27_p4), %s1418_s0, %s1195_s8  ;;  %s1029_s19 = sshll.u32 (%p27_p4), %s82_s15, 3 }
  0x11   : > { %v102_v0 = vld [vmem:[%s85_s18] sm:$0x1] (%p27_p4)  ;;  %v104_v1 = vld [vmem:[%s85_s18 + $0x2] sm:$0x1] (%p27_p4)  ;;  %v106_v2 = vld [vmem:[%s85_s18 + $0x4] sm:$0x1] (%p27_p4) }
  0x12   : > { %v108_v3 = vld [vmem:[%s85_s18 + $0x6] sm:$0x1] (%p27_p4)  ;;  %s84_s20 = scalar_lea.vmem (%p27_p4), [#allocation2], %s1029_s19  ;;  %v110_v4 = vld [vmem:[%s85_s18 + $0x8] sm:$0x1] (%p27_p4) }
  0x13   : > { %103 = vst [vmem:[%s84_s20] sm:$0x1] (%p27_p4), %v102_v0  ;;  %105 = vst [vmem:[%s84_s20 + $0x1] sm:$0x1] (%p27_p4), %v104_v1  ;;  %v112_v5 = vld [vmem:[%s85_s18 + $0xa] sm:$0x1] (%p27_p4) }
  0x14   : > { %107 = vst [vmem:[%s84_s20 + $0x2] sm:$0x1] %v106_v2  ;;  %109 = vst [vmem:[%s84_s20 + $0x3] sm:$0x1] %v108_v3  ;;  %v114_v6 = vld [vmem:[%s85_s18 + $0xc] sm:$0x1] }
  0x15   : > { %111 = vst [vmem:[%s84_s20 + $0x4] sm:$0x1] %v110_v4  ;;  %113 = vst [vmem:[%s84_s20 + $0x5] sm:$0x1] %v112_v5  ;;  %v116_v7 = vld [vmem:[%s85_s18 + $0xe] sm:$0x1] }
  0x16   : > { %115 = vst [vmem:[%s84_s20 + $0x6] sm:$0x1] %v114_v6  ;;  %117 = vst [vmem:[%s84_s20 + $0x7] sm:$0x1] %v116_v7 }
  0x17 PF: > { %p1030_p7 = scmp.ge.s32.totalorder %s1195_s8, 1  ;;  %p156_p8 = scmp.lt.s32.totalorder %s1195_s8, 3 }
  0x19   : > { %p157_p9 = pnand %p1030_p7, %p156_p8 }
  0x1a   : > { %s163_s21 = sand.u32 (!%p157_p9), 1, %s1187_s6   ;;  %s1200_s24 = smov (!%p157_p9), 120  }
  0x1b   : > { %160 = sbr.rel (%p157_p9) target bundleno = 1596 (0x63c), region = 61  ;;  %s1267_s22 = sshll.u32 (!%p157_p9), %s163_s21, 3 }
  0x1c   : > { %s165_s23 = scalar_lea.vmem (!%p157_p9), [#allocation2], %s1267_s22  ;;  %s1201_s25 = smov (!%p157_p9), 112  }
  0x1d   : > { %s1202_s26 = smov (!%p157_p9), 96   ;;  %s1203_s27 = smov (!%p157_p9), 48  }
  0x1e   : > { %s1204_s28 = smov (!%p157_p9), 104   ;;  %s1205_s29 = smov (!%p157_p9), 72  }
  0x1f   : > { %s1206_s30 = smov (!%p157_p9), 80   ;;  %s1207_s2 = smov (!%p157_p9), 56  }
  0x20   : > { %v208_v8 = vlaneseq  ;;  %v1197_v9 = vmov 1966171168   ;;  %v1033_v12 = vld.sshfl [vmem:[%s165_s23] sm:$0x1 pattern:$0x75316420]  ;;  %s901_s18 = scalar_lea.vmem (%p1254_p5), %s1419_s1, %s1025_s9 }
  0x21   : > { %v206_v10 = vunpack.c.l.s4 %v1197_v9  ;;  %v1034_v14 = vld.sshfl [vmem:[%s165_s23 + $0x1] sm:$0x1 pattern:$0x75316420]  ;;  %vm319_vm0 = vcmask 1041409   ;;  %vm322_vm1 = vcmask 1042434  }
  0x22   : > { %v209_v11 = vshrl.u32 %v208_v8, 7  ;;  %v1035_v15 = vld.sshfl [vmem:[%s165_s23 + $0x2] sm:$0x1 pattern:$0x75316420]  ;;  %v1198_v30 = vmov 0.0  }
  0x23   : > { %v207_v13 = vunpack.c.0.s8 %v206_v10  ;;  %v1036_v17 = vld.sshfl [vmem:[%s165_s23 + $0x3] sm:$0x1 pattern:$0x75316420]  ;;  %1068 = vmatprep.subr.bf16.mxu0 %v1198_v30  ;;  %1074 = vmatprep.subr.bf16.mxu1 %v1198_v30  ;;  %vm1199_vm2 = vmmov 0   ;;  %vm325_vm3 = vcmask 1043459  }
  0x24   : > { %v1037_v18 = vld.sshfl [vmem:[%s165_s23 + $0x4] sm:$0x1 pattern:$0x75316420]  ;;  %1070 = vmatprep.mubr.msk.bf16.mxu0 %vm1199_vm2, %v1198_v30  ;;  %1076 = vmatprep.mubr.msk.bf16.mxu1 %vm1199_vm2, %v1198_v30  ;;  %vm328_vm4 = vcmask 1044484   ;;  %vm331_vm5 = vcmask 1045509  }
  0x25   : > { %v1270_v16 = vsub.s32 %v207_v13, %v209_v11  ;;  %v1038_v23 = vld.sshfl [vmem:[%s165_s23 + $0x5] sm:$0x1 pattern:$0x75316420]  ;;  %vm334_vm6 = vcmask 1046534   ;;  %vm337_vm7 = vcmask 1047559  }
  0x26   : > { %v1039_v25 = vld.sshfl [vmem:[%s165_s23 + $0x6] sm:$0x1 pattern:$0x75316420]  ;;  %vm342_vm8 = vcmask 64512   ;;  %vm407_vm9 = vcmask 1043456  }
  0x27   : > { %v211_v19 = vrot.slane %v1033_v12, %v1270_v16  ;;  %v225_v20 = vrot.slane %v1034_v14, %v1270_v16  ;;  %v239_v21 = vrot.slane %v1035_v15, %v1270_v16  ;;  %v253_v22 = vrot.slane %v1036_v17, %v1270_v16  ;;  %v1040_v31 = vld.sshfl [vmem:[%s165_s23 + $0x7] sm:$0x1 pattern:$0x75316420]  ;;  %s1208_s3 = smov 88   ;;  %s1209_s4 = smov 64  }
  0x28   : > { %v267_v24 = vrot.slane %v1037_v18, %v1270_v16  ;;  %v281_v26 = vrot.slane %v1038_v23, %v1270_v16  ;;  %v295_v32 = vrot.slane %v1039_v25, %v1270_v16  ;;  %v309_v35 = vrot.slane %v1040_v31, %v1270_v16  ;;  %s1210_s5 = smov 40   ;;  %s1211_s6 = smov 8  }
  0x29   : > { %v310_v27 = vunpack.c.l.b16 %v211_v19  ;;  %v311_v28 = vunpack.c.l.b16 %v225_v20  ;;  %v312_v29 = vunpack.c.l.b16 %v239_v21  ;;  %v313_v33 = vunpack.c.l.b16 %v253_v22  ;;  %s1212_s11 = smov 16   ;;  %s1213_s12 = smov 24  }
  0x2a   : > { %v314_v34 = vunpack.c.l.b16 %v267_v24  ;;  %v315_v36 = vunpack.c.l.b16 %v281_v26  ;;  %v316_v39 = vunpack.c.l.b16 %v295_v32  ;;  %v317_v42 = vunpack.c.l.b16 %v309_v35  ;;  %s1356_s15 = scalar_lea.vmem [#allocation3], %s1267_s22 }
  0x2b   : > { %v318_v37 = vrot.slane %v311_v28, 7  ;;  %v321_v38 = vrot.slane %v312_v29, 6  ;;  %v324_v40 = vrot.slane %v313_v33, 5  ;;  %vm797_vm10 = vcmask 130048  }
  0x2c   : > { %v327_v41 = vrot.slane %v314_v34, 4  ;;  %v330_v44 = vrot.slane %v315_v36, 3  ;;  %v333_v46 = vrot.slane %v316_v39, 2  ;;  %v336_v48 = vrot.slane %v317_v42, 1 }
  0x2d   : > { %v320_v43 = vsel %vm319_vm0, %v318_v37, %v310_v27  ;;  %vm799_vm11 = vcmask 195584   ;;  %vm867_vm12 = vcmask 253952   ;;  %vm868_vm13 = vsmask.f32 256 }
  0x2e   : > { %v323_v45 = vsel %vm322_vm1, %v321_v38, %v320_v43  ;;  %vm1351_vm14 = vmand %vm867_vm12, %vm868_vm13 }
  0x2f   : > { %v326_v47 = vsel %vm325_vm3, %v324_v40, %v323_v45 }
  0x30   : > { %v329_v49 = vsel %vm328_vm4, %v327_v41, %v326_v47 }
  0x31   : > { %v332_v50 = vsel %vm331_vm5, %v330_v44, %v329_v49 }
  0x32   : > { %v335_v51 = vsel %vm334_vm6, %v333_v46, %v332_v50 }
  0x33   : > { %v338_v52 = vsel %vm337_vm7, %v336_v48, %v335_v51 }
  0x34   : > { %v1288_v53 = vpack.c.b16 %v338_v52, %v338_v52 }
  0x36   : > { %340 = vrot.lane.b32.xlu0 %v1288_v53, %s1200_s24  ;;  %402 = vrot.lane.b32.xlu1 %v1288_v53, %s1201_s25 }
  0x3a   : > { %453 = vrot.lane.b32.xlu1 %v1288_v53, %s1202_s26 }
  0xa8   : > { %v341_v54 = vpop.permute.xlu0 %340  ;;  %v403_v62 = vpop.permute.xlu1 %402 }
  0xa9   : > { %v347_v55 = vsel %vm342_vm8, %v341_v54, 0  ;;  %v409_v63 = vsel %vm407_vm9, %v403_v62, 0 }
  0xaa   : > { %1069 = vmatpush3.bf16.xpose.msra.mxu0 %v347_v55  ;;  %1075 = vmatpush3.bf16.msra.mxu1 %v409_v63 }
  0xab   : > { %1086 = vmatprep.subr.bf16.mxu0 %v1198_v30  ;;  %1080 = vmatprep.subr.bf16.mxu1 %v1198_v30 }
  0xac   : > { %v454_v5 = vpop.permute.xlu1 %453 }
  0xad   : > { %v459_v11 = vsel %vm342_vm8, %v454_v5, 0 }
  0xb1   : > { %1071 = vmatmul.mubr.msk.bf16.vlgmr.msra.gmra.mxu0 %vm342_vm8, %v1288_v53 }
  0xb2   : > { %1088 = vmatprep.mubr.msk.bf16.mxu0 %vm1199_vm2, %v1198_v30 }
 0x171   : > { %v383_v56 = vpop.f32.mrf.mxu0 }
 0x172   : > { %v389_v57 = vmul.f32 0.35355338, %v383_v56 }
 0x173   : > { %v1072_v58 = vpop.f32.mrf.mxu0 }
 0x174   : > { %v390_v59 = vsel %vm342_vm8, %v389_v57, -inf }
 0x175   : > { %391 = vmax.xlane.f32.xlu0 %v390_v59  ;;  %v386_v60 = vpop.f32.mrf.mxu0 }
 0x177   : > { %v1073_v61 = vpop.f32.mrf.mxu0 }
 0x18b   : > { %675 = vrot.lane.b32.xlu0 %v1288_v53, %s1203_s27 }
 0x1fe   : > { %v392_v0 = vpop.xlane.xlu0 %391 }
 0x1ff   : > { %v393_v1 = vsub.f32 %v389_v57, %v392_v0 }
 0x201   : > { %v394_v2 = vmul.f32 1.442695, %v393_v1 }
 0x202   : > { %v676_v14 = vpop.permute.xlu0 %675 }
 0x203   : > { %1157 = vpow2.f32 %v394_v2  ;;  %v681_v17 = vsel %vm342_vm8, %v676_v14, 0 }
 0x210   : > { %v1158_v3 = vpop.eup %1157 }
 0x211   : > { %v396_v4 = vsel %vm342_vm8, %v1158_v3, 0.0 }
 0x212   : > { %397 = vadd.xlane.f32.xlu1 %v396_v4 }
 0x223   : > { %451 = vrot.lane.b32.xlu1 %v1288_v53, %s1204_s28 }
 0x227   : > { %564 = vrot.lane.b32.xlu1 %v1288_v53, %s1205_s29 }
 0x22b   : > { %562 = vrot.lane.b32.xlu1 %v1288_v53, %s1206_s30 }
 0x22f   : > { %673 = vrot.lane.b32.xlu1 %v1288_v53, %s1207_s2 }
 0x29b   : > { %v398_v6 = vpop.xlane.xlu1 %397 }
 0x29c   : > { %1159 = vrcp.f32 %v398_v6 }
 0x29f   : > { %v452_v9 = vpop.permute.xlu1 %451 }
 0x2a3   : > { %v565_v12 = vpop.permute.xlu1 %564 }
 0x2a4   : > { %v570_v13 = vsel %vm342_vm8, %v565_v12, 0 }
 0x2a7   : > { %v563_v15 = vpop.permute.xlu1 %562 }
 0x2a9   : > { %v1160_v7 = vpop.eup %1159 }
 0x2aa   : > { %v400_v8 = vmul.f32 %v1160_v7, %v1158_v3 }
 0x2ab   : > { %v674_v18 = vpop.permute.xlu1 %673 }
 0x2ac   : > { %v401_v10 = vpack.c.bf16 %v400_v8, %v400_v8 }
 0x2ae   : > { %1077 = vmatmul.mubr.msk.bf16.vlgmr.msra.gmra.mxu1 %vm342_vm8, %v401_v10 }
 0x2af   : > { %1081 = vmatpush3.bf16.xpose.msra.mxu1 %v459_v11  ;;  %1082 = vmatprep.mubr.msk.bf16.mxu1 %vm1199_vm2, %v1198_v30 }
 0x2b0   : > { %1092 = vmatprep.subr.bf16.mxu1 %v1198_v30 }
 0x2b6   : > { %1083 = vmatmul.mubr.msk.bf16.vlgmr.msra.gmra.mxu1 %vm342_vm8, %v452_v9 }
 0x2b7   : > { %1093 = vmatpush3.bf16.xpose.msra.mxu1 %v570_v13  ;;  %1094 = vmatprep.mubr.msk.bf16.mxu1 %vm1199_vm2, %v1198_v30 }
 0x2b8   : > { %1104 = vmatprep.subr.bf16.mxu1 %v1198_v30 }
 0x2be   : > { %1095 = vmatmul.mubr.msk.bf16.vlgmr.msra.gmra.mxu1 %vm342_vm8, %v563_v15 }
 0x2bf   : > { %1105 = vmatpush3.bf16.xpose.msra.mxu1 %v681_v17  ;;  %1106 = vmatprep.mubr.msk.bf16.mxu1 %vm1199_vm2, %v1198_v30 }
 0x2c6   : > { %1107 = vmatmul.mubr.msk.bf16.vlgmr.msra.gmra.mxu1 %vm342_vm8, %v674_v18 }
 0x36e   : > { %v1323_v19 = vpop.f32.mrf.mxu1 }
 0x370   : > { %v1078_v20 = vpop.f32.mrf.mxu1 }
 0x372   : > { %v448_v21 = vpop.f32.mrf.mxu1 }
 0x374   : > { %v1079_v22 = vpop.f32.mrf.mxu1 }
 0x376   : > { %v495_v23 = vpop.f32.mrf.mxu1 }
 0x377   : > { %v501_v24 = vmul.f32 0.35355338, %v495_v23 }
 0x378   : > { %v1084_v25 = vpop.f32.mrf.mxu1 }
 0x379   : > { %v502_v26 = vsel %vm342_vm8, %v501_v24, -inf }
 0x37a   : > { %503 = vmax.xlane.f32.xlu1 %v502_v26  ;;  %v498_v27 = vpop.f32.mrf.mxu1 }
 0x37c   : > { %v1085_v28 = vpop.f32.mrf.mxu1 }
 0x37e   : > { %v606_v29 = vpop.f32.mrf.mxu1 }
 0x37f   : > { %v612_v31 = vmul.f32 0.35355338, %v606_v29 }
 0x380   : > { %v1096_v32 = vpop.f32.mrf.mxu1 }
 0x381   : > { %v613_v33 = vsel %vm342_vm8, %v612_v31, -inf }
 0x382   : > { %614 = vmax.xlane.f32.xlu0 %v613_v33  ;;  %v609_v34 = vpop.f32.mrf.mxu1 }
 0x384   : > { %v1097_v35 = vpop.f32.mrf.mxu1 }
 0x386   : > { %v717_v36 = vpop.f32.mrf.mxu1 }
 0x387   : > { %v723_v37 = vmul.f32 0.35355338, %v717_v36 }
 0x388   : > { %v1108_v38 = vpop.f32.mrf.mxu1 }
 0x389   : > { %v724_v39 = vsel %vm342_vm8, %v723_v37, -inf }
 0x38a   : > { %725 = vmax.xlane.f32.xlu1 %v724_v39  ;;  %v720_v40 = vpop.f32.mrf.mxu1 }
 0x38c   : > { %v1109_v41 = vpop.f32.mrf.mxu1 }
 0x403   : > { %v504_v42 = vpop.xlane.xlu1 %503 }
 0x404   : > { %v505_v43 = vsub.f32 %v501_v24, %v504_v42  ;;  %v873_v42 = vld [vmem:[%s1356_s15 + $0x1] sm:$0x1] }
 0x406   : > { %v506_v44 = vmul.f32 1.442695, %v505_v43  ;;  %v876_v43 = vld [vmem:[%s1356_s15 + $0x2] sm:$0x1] }
 0x408   : > { %1161 = vpow2.f32 %v506_v44  ;;  %v882_v44 = vld [vmem:[%s1356_s15 + $0x4] sm:$0x1] }
 0x40b   : > { %v615_v52 = vpop.xlane.xlu0 %614 }
 0x40c   : > { %v616_v54 = vsub.f32 %v612_v31, %v615_v52 }
 0x40e   : > { %v617_v55 = vmul.f32 1.442695, %v616_v54 }
 0x413   : > { %v726_v45 = vpop.xlane.xlu1 %725 }
 0x414   : > { %v727_v46 = vsub.f32 %v723_v37, %v726_v45 }
 0x415   : > { %v1162_v47 = vpop.eup %1161 }
 0x416   : > { %v728_v48 = vmul.f32 1.442695, %v727_v46  ;;  %v508_v49 = vsel %vm342_vm8, %v1162_v47, 0.0 }
 0x417   : > { %509 = vadd.xlane.f32.xlu1 %v508_v49  ;;  %v879_v49 = vld [vmem:[%s1356_s15 + $0x3] sm:$0x1] }
 0x418   : > { %1163 = vpow2.f32 %v728_v48 }
 0x419   : > { %1165 = vpow2.f32 %v617_v55 }
 0x425   : > { %v1164_v50 = vpop.eup %1163 }
 0x426   : > { %v730_v51 = vsel %vm342_vm8, %v1164_v50, 0.0  ;;  %v1166_v56 = vpop.eup %1165 }
 0x427   : > { %731 = vadd.xlane.f32.xlu0 %v730_v51  ;;  %v619_v57 = vsel %vm342_vm8, %v1166_v56, 0.0  ;;  %v888_v51 = vld [vmem:[%s1356_s15 + $0x6] sm:$0x1] }
 0x428   : > { %514 = vrot.lane.b32.xlu1 %v1288_v53, %s1208_s3 }
 0x43d   : > { %625 = vrot.lane.b32.xlu0 %v1288_v53, %s1209_s4 }
 0x44c   : > { %620 = vadd.xlane.f32.xlu1 %v619_v57 }
 0x45d   : > { %736 = vrot.lane.b32.xlu1 %v1288_v53, %s1210_s5 }
 0x4a0   : > { %v510_v58 = vpop.xlane.xlu1 %509 }
 0x4a1   : > { %1167 = vrcp.f32 %v510_v58 }
 0x4a4   : > { %v515_v59 = vpop.permute.xlu1 %514 }
 0x4a5   : > { %v520_v60 = vsel %vm407_vm9, %v515_v59, 0  ;;  %v891_v59 = vld [vmem:[%s1356_s15 + $0x7] sm:$0x1] }
 0x4a6   : > { %1087 = vmatpush3.bf16.msra.mxu0 %v520_v60 }
 0x4a7   : > { %1098 = vmatprep.subr.bf16.mxu0 %v1198_v30 }
 0x4ae   : > { %v1168_v61 = vpop.eup %1167 }
 0x4af   : > { %v512_v62 = vmul.f32 %v1168_v61, %v1162_v47 }
 0x4b0   : > { %v732_v63 = vpop.xlane.xlu0 %731 }
 0x4b1   : > { %v513_v0 = vpack.c.bf16 %v512_v62, %v512_v62 }
 0x4b3   : > { %1089 = vmatmul.mubr.msk.bf16.vlgmr.msra.gmra.mxu0 %vm342_vm8, %v513_v0 }
 0x4b4   : > { %v626_v1 = vpop.permute.xlu0 %625  ;;  %1100 = vmatprep.mubr.msk.bf16.mxu0 %vm1199_vm2, %v1198_v30 }
 0x4b5   : > { %v631_v53 = vsel %vm407_vm9, %v626_v1, 0 }
 0x4b6   : > { %1099 = vmatpush3.bf16.msra.mxu0 %v631_v53 }
 0x4b7   : > { %1110 = vmatprep.subr.bf16.mxu0 %v1198_v30 }
 0x4d5   : > { %v621_v2 = vpop.xlane.xlu1 %620 }
 0x4d6   : > { %1169 = vrcp.f32 %v621_v2 }
 0x4d7   : > { %1171 = vrcp.f32 %v732_v63 }
 0x4d9   : > { %v737_v4 = vpop.permute.xlu1 %736 }
 0x4da   : > { %v742_v6 = vsel %vm407_vm9, %v737_v4, 0 }
 0x4e3   : > { %v1170_v3 = vpop.eup %1169 }
 0x4e4   : > { %v623_v5 = vmul.f32 %v1170_v3, %v1166_v56  ;;  %v1172_v8 = vpop.eup %1171 }
 0x4e5   : > { %v734_v9 = vmul.f32 %v1172_v8, %v1164_v50  ;;  %v885_v50 = vld [vmem:[%s1356_s15 + $0x5] sm:$0x1] }
 0x4e6   : > { %v624_v7 = vpack.c.bf16 %v623_v5, %v623_v5 }
 0x4e7   : > { %v735_v10 = vpack.c.bf16 %v734_v9, %v734_v9 }
 0x4e8   : > { %1101 = vmatmul.mubr.msk.bf16.vlgmr.msra.gmra.mxu0 %vm342_vm8, %v624_v7 }
 0x4e9   : > { %1111 = vmatpush3.bf16.msra.mxu0 %v742_v6  ;;  %1112 = vmatprep.mubr.msk.bf16.mxu0 %vm1199_vm2, %v1198_v30 }
 0x4f0   : > { %1113 = vmatmul.mubr.msk.bf16.vlgmr.msra.gmra.mxu0 %vm342_vm8, %v735_v10 }
 0x573   : > { %v556_v11 = vpop.f32.mrf.mxu0 }
 0x574   : > { %785 = vrot.lane.b32.xlu1 %v556_v11, %s1211_s6 }
 0x575   : > { %v1090_v12 = vpop.f32.mrf.mxu0 }
 0x577   : > { %v559_v13 = vpop.f32.mrf.mxu0 }
 0x579   : > { %v1091_v14 = vpop.f32.mrf.mxu0 }
 0x5a8   : > { %v667_v15 = vpop.f32.mrf.mxu0 }
 0x5a9   : > { %789 = vrot.lane.b32.xlu0 %v667_v15, %s1212_s11 }
 0x5aa   : > { %v1102_v17 = vpop.f32.mrf.mxu0 }
 0x5ac   : > { %v670_v18 = vpop.f32.mrf.mxu0 }
 0x5ae   : > { %v1103_v20 = vpop.f32.mrf.mxu0 }
 0x5b0   : > { %v778_v21 = vpop.f32.mrf.mxu0 }
 0x5b1   : > { %793 = vrot.lane.b32.xlu1 %v778_v21, %s1213_s12 }
 0x5b2   : > { %v1114_v30 = vpop.f32.mrf.mxu0 }
 0x5b4   : > { %v781_v22 = vpop.f32.mrf.mxu0 }
 0x5b6   : > { %v1115_v23 = vpop.f32.mrf.mxu0 }
 0x5e6   : > { %v786_v24 = vpop.permute.xlu1 %785 }
 0x5e7   : > { %v796_v26 = vsel %vm342_vm8, %v1323_v19, %v786_v24  ;;  %v870_v19 = vld [vmem:[%s1356_s15] sm:$0x1] }
 0x61b   : > { %v790_v25 = vpop.permute.xlu0 %789 }
 0x61c   : > { %v798_v27 = vsel %vm797_vm10, %v796_v26, %v790_v25 }
 0x623   : > { %v794_v28 = vpop.permute.xlu1 %793 }
 0x624   : > { %v800_v29 = vsel %vm799_vm11, %v798_v27, %v794_v28 }
 0x625   : > { %v802_v31 = vcombine.high %v800_v29, %v800_v29  ;;  %v809_v32 = vrot.slane %v800_v29, %v1270_v16 }
 0x627   : > { %v816_v33 = vrot.slane %v802_v31, %v1270_v16  ;;  %v817_v34 = vcombine.high %v809_v32, %v809_v32  ;;  %v825_v35 = vrot.slane %v809_v32, %v1270_v16 }
 0x629   : > { %v818_v37 = vcombine.high %v816_v33, %v816_v33  ;;  %v832_v38 = vrot.slane %v816_v33, %v1270_v16  ;;  %v839_v39 = vrot.slane %v817_v34, %v1270_v16  ;;  %v847_v40 = vcombine.high %v825_v35, %v825_v35 }
 0x62a   : > { %v859_v41 = vpack.c.bf16 %v825_v35, %v825_v35 }
 0x62b   : > { %v846_v45 = vrot.slane %v818_v37, %v1270_v16  ;;  %v848_v46 = vcombine.high %v832_v38, %v832_v38  ;;  %v849_v47 = vcombine.high %v839_v39, %v839_v39  ;;  %v860_v48 = vpack.c.bf16 %v839_v39, %v839_v39 }
 0x62c   : > { %v861_v52 = vpack.c.bf16 %v847_v40, %v847_v40  ;;  %v863_v54 = vpack.c.bf16 %v832_v38, %v832_v38  ;;  %v871_v55 = vsel %vm1351_vm14, %v859_v41, %v870_v19 }
 0x62d   : > { %v850_v56 = vcombine.high %v846_v45, %v846_v45  ;;  %v862_v57 = vpack.c.bf16 %v849_v47, %v849_v47  ;;  %v864_v58 = vpack.c.bf16 %v846_v45, %v846_v45  ;;  %v865_v16 = vpack.c.bf16 %v848_v46, %v848_v46  ;;  %872 = vst [vmem:[%s1356_s15] sm:$0x1] %v871_v55 }
 0x62e   : > { %v874_v60 = vsel %vm1351_vm14, %v860_v48, %v873_v42  ;;  %v877_v61 = vsel %vm1351_vm14, %v861_v52, %v876_v43  ;;  %v883_v62 = vsel %vm1351_vm14, %v863_v54, %v882_v44  ;;  %900 = sbr.rel (!%p1254_p5) target bundleno = 1596 (0x63c), region = 69 }
 0x62f   : > { %v866_v63 = vpack.c.bf16 %v850_v56, %v850_v56  ;;  %875 = vst [vmem:[%s1356_s15 + $0x1] sm:$0x1] %v874_v60  ;;  %878 = vst [vmem:[%s1356_s15 + $0x2] sm:$0x1] %v877_v61  ;;  %v880_v0 = vsel %vm1351_vm14, %v862_v57, %v879_v49  ;;  %v886_v1 = vsel %vm1351_vm14, %v864_v58, %v885_v50 }
 0x630   : > { %884 = vst [vmem:[%s1356_s15 + $0x4] sm:$0x1] %v883_v62  ;;  %v889_v53 = vsel %vm1351_vm14, %v865_v16, %v888_v51  ;;  %881 = vst [vmem:[%s1356_s15 + $0x3] sm:$0x1] %v880_v0 }
 0x631   : > { %887 = vst [vmem:[%s1356_s15 + $0x5] sm:$0x1] %v886_v1  ;;  %890 = vst [vmem:[%s1356_s15 + $0x6] sm:$0x1] %v889_v53  ;;  %v892_v2 = vsel %vm1351_vm14, %v866_v63, %v891_v59 }
 0x632   : > { %893 = vst [vmem:[%s1356_s15 + $0x7] sm:$0x1] %v892_v2 }
 0x634   : > { %v918_v3 = vld [vmem:[%s1356_s15] sm:$0x1] }
 0x635   : > { %919 = vst [vmem:[%s901_s18] sm:$0x1] %v918_v3 }
 0x636   : > { %v920_v4 = vld [vmem:[%s1356_s15 + $0x1] sm:$0x1]  ;;  %v922_v5 = vld [vmem:[%s1356_s15 + $0x2] sm:$0x1] }
 0x637   : > { %921 = vst [vmem:[%s901_s18 + $0x2] sm:$0x1] %v920_v4  ;;  %923 = vst [vmem:[%s901_s18 + $0x4] sm:$0x1] %v922_v5  ;;  %v924_v6 = vld [vmem:[%s1356_s15 + $0x3] sm:$0x1] }
 0x638   : > { %v926_v7 = vld [vmem:[%s1356_s15 + $0x4] sm:$0x1]  ;;  %v928_v8 = vld [vmem:[%s1356_s15 + $0x5] sm:$0x1]  ;;  %925 = vst [vmem:[%s901_s18 + $0x6] sm:$0x1] %v924_v6 }
 0x639   : > { %927 = vst [vmem:[%s901_s18 + $0x8] sm:$0x1] %v926_v7  ;;  %929 = vst [vmem:[%s901_s18 + $0xa] sm:$0x1] %v928_v8  ;;  %v930_v9 = vld [vmem:[%s1356_s15 + $0x6] sm:$0x1] }
 0x63a   : > { %v932_v10 = vld [vmem:[%s1356_s15 + $0x7] sm:$0x1]  ;;  %931 = vst [vmem:[%s901_s18 + $0xc] sm:$0x1] %v930_v9 }
 0x63b   : > { %933 = vst [vmem:[%s901_s18 + $0xe] sm:$0x1] %v932_v10 }
 0x63c PF: > { %p8_p10 = scmp.ge.s32.totalorder %s1241_s10, 4   ;;  %s1423_s6 = smov %s1191_s7 }
 0x63d   : > { %s1424_s7 = smov %s1252_s13  ;;  %s1425_s8 = smov %s1241_s10 }
 0x63e   :  { %10 = sbr.rel (!%p8_p10) target bundleno = 2 (0x2), region = 141 }

// kernel: test_model_forward.19
= control target key start
LH: loop header
LB: loop body
LE: loop exit
PB: predicated region body
PF: predicated region fallthrough
CT: control target
= control target key end

     0   :  { %v237_v1 = vmov 0.0   ;;  %vm238_vm0 = vmmov 0   ;;  %s306_s0 = inlined_call_operand.vmem [shape: bf16[16,128], index: 0, kind: input, shape index: {}]   ;;  %s307_s1 = inlined_call_operand.vmem [shape: bf16[128,32], index: 1, kind: input, shape index: {}]   ;;  %s308_s2 = inlined_call_operand.vmem [shape: f32[1,32], index: 2, kind: input, shape index: {}]   ;;  %s309_s3 = inlined_call_operand.vmem [shape: f32[16,32], index: 3, kind: input, shape index: {}]   ;;  %s310_s4 = inlined_call_operand.hbm [shape: f32[16,32], index: 4, kind: output, shape index: {}]  }
   0x1   :  { %v206_v0 = vld [vmem:[%s307_s1 + $0x38] sm:$0xff]   ;;  %181 = vmatprep.subr.bf16.mxu0 %v237_v1  ;;  %v207_v2 = vld [vmem:[%s307_s1 + $0x30] sm:$0xff]   ;;  %197 = vmatprep.mubr.msk.bf16.mxu0 %vm238_vm0, %v237_v1  ;;  %v208_v3 = vld [vmem:[%s307_s1 + $0x28] sm:$0xff]  }
   0x2   :  { %182 = vmatpush3.bf16.msra.mxu0 %v206_v0 }
   0x3   :  { %183 = vmatprep.subr.bf16.mxu0 %v237_v1 }
   0x6   :  { %184 = vmatpush3.bf16.msra.mxu0 %v207_v2 }
   0x7   :  { %185 = vmatprep.subr.bf16.mxu0 %v237_v1 }
   0x8   :  { %9 = vsyncpa [#allocation3], 0  ;;  %v209_v4 = vld [vmem:[%s307_s1 + $0x20] sm:$0xff]   ;;  %v210_v5 = vld [vmem:[%s307_s1 + $0x18] sm:$0xff]   ;;  %vm143_vm1 = vcmask 261120  }
   0x9   :  { %v211_v6 = vld [vmem:[%s307_s1 + $0x10] sm:$0xff]   ;;  %v212_v7 = vld [vmem:[%s307_s1 + $0x8] sm:$0xff]   ;;  %v213_v8 = vld [vmem:[%s307_s1] sm:$0xff]   ;;  %s239_s1 = smov [#allocation2]  }
   0xa   :  { %186 = vmatpush3.bf16.msra.mxu0 %v208_v3  ;;  %v214_v9 = vld [vmem:[%s306_s0] sm:$0xff]   ;;  %s151_s11 = sshll.u32 %s239_s1, 4  ;;  %v140_v17 = vld [vmem:[%s309_s3 + $0x8] sm:$0xff]  ;;  %s152_s11 = int_to_ptr.vmem [resolvable:$true] %s151_s11 }
   0xb   :  { %187 = vmatprep.subr.bf16.mxu0 %v237_v1  ;;  %v162_v10 = vld [vmem:[%s308_s2] ss:$0 sm:$0xff]  ;;  %s215_s2 = scalar_lea.vmem %s152_s11, 256  ;;  %p220_p1 = scmp.lt.s32.totalorder %s152_s11, %s152_s11 }
   0xc   :  { %v139_v12 = vld [vmem:[%s309_s3] sm:$0xff]  ;;  %p216_p0 = scmp.ne.s32.totalorder %s152_s11, %s215_s2  ;;  %p221_p2 = scmp.lt.s32.totalorder %s215_s2, %s215_s2 }
   0xe   :  { %188 = vmatpush3.bf16.msra.mxu0 %v209_v4  ;;  %p222_p3 = por %p221_p2, %p220_p1 }
   0xf   :  { %189 = vmatprep.subr.bf16.mxu0 %v237_v1 }
  0x10   :  { %p223_p4 = pnand %p222_p3, %p216_p0 }
  0x12   :  { %190 = vmatpush3.bf16.msra.mxu0 %v210_v5 }
  0x13   :  { %191 = vmatprep.subr.bf16.mxu0 %v237_v1 }
  0x16   :  { %192 = vmatpush3.bf16.msra.mxu0 %v211_v6 }
  0x17   :  { %193 = vmatprep.subr.bf16.mxu0 %v237_v1 }
  0x1a   :  { %194 = vmatpush3.bf16.msra.mxu0 %v212_v7 }
  0x1b   :  { %195 = vmatprep.subr.bf16.mxu0 %v237_v1 }
  0x1e   :  { %196 = vmatpush3.bf16.msra.mxu0 %v213_v8 }
  0x21   :  { %198 = vmatmul.mubr.bf16.vlgmr.msra.gmra.mxu0 %v214_v9 }
  0xe1   :  { %v132_v11 = vpop.f32.mrf.mxu0 }
  0xe2   :  { %v133_v13 = vadd.f32 %v162_v10, %v132_v11 }
  0xe3   :  { %v199_v14 = vpop.f32.mrf.mxu0 }
  0xe4   :  { %v141_v15 = vadd.f32 %v139_v12, %v133_v13 }
  0xe5   :  { %v135_v16 = vpop.f32.mrf.mxu0 }
  0xe6   :  { %144 = vst.msk [vmem:[#allocation2] sm:$0xff] %vm143_vm1, %v141_v15  ;;  %v136_v18 = vadd.f32 %v162_v10, %v135_v16 }
  0xe7   :  { %v200_v19 = vpop.f32.mrf.mxu0 }
  0xe8   :  { %v142_v20 = vadd.f32 %v140_v17, %v136_v18 }
  0xea   :  { %145 = vst.msk [vmem:[#allocation2 + $0x8] sm:$0xff] %vm143_vm1, %v142_v20 }
  0xeb   :  { %226 = shalt.err (!%p223_p4)
}
  0xec   :  { %s240_s13 = smov 128   ;;  %s241_s14 = smov 8  }
  0xed   :  { %157 = dma.vmem_to_hbm [thread:$0]  %s152_s11, 256, %s310_s4, [#allocation3], %s240_s13, %s240_s13, %s241_s14  }
  0xee   :  { %235 = dma.done.wait [#allocation3], 256  }
  0xef   :  { %236 = vsyncadd [#allocation3], 4294967040 }
  0xf0   :  { %161 = vsyncpa [#allocation3], 1 }

// kernel: test_model_forward.15
= control target key start
LH: loop header
LB: loop body
LE: loop exit
PB: predicated region body
PF: predicated region fallthrough
CT: control target
= control target key end

     0   :  { %vm27_vm0 = vcmask 261120   ;;  %v209_v15 = vmov 0.0   ;;  %vm210_vm1 = vmmov 0   ;;  %vm81_vm2 = vcmask 257024   ;;  %s273_s0 = inlined_call_operand.vmem [shape: f32[16,32], index: 0, kind: input, shape index: {}]   ;;  %s274_s3 = inlined_call_operand.vmem [shape: bf16[32,96], index: 3, kind: input, shape index: {}]   ;;  %s275_s1 = inlined_call_operand.vmem [shape: f32[1,32], index: 1, kind: input, shape index: {}]   ;;  %s276_s2 = inlined_call_operand.vmem [shape: f32[1,32], index: 2, kind: input, shape index: {}]   ;;  %s277_s4 = inlined_call_operand.vmem [shape: f32[1,96], index: 4, kind: input, shape index: {}]   ;;  %s278_s5 = inlined_call_operand.vmem [shape: bf16[16,96], index: 5, kind: output, shape index: {}]  }
   0x1   :  { %v25_v0 = vld [vmem:[%s273_s0] sm:$0xff]  ;;  %v26_v1 = vld [vmem:[%s273_s0 + $0x8] sm:$0xff]  ;;  %192 = vmatprep.subr.bf16.mxu0 %v209_v15  ;;  %196 = vmatprep.mubr.msk.bf16.mxu0 %vm210_vm1, %v209_v15  ;;  %vm167_vm3 = vcmask 781312  }
   0x2   :  { %v28_v2 = vsel %vm27_vm0, %v25_v0, 0.0  ;;  %v31_v3 = vsel %vm27_vm0, %v26_v1, 0.0  ;;  %v202_v14 = vld [vmem:[%s274_s3 + $0x8] sm:$0xff]   ;;  %v203_v16 = vld [vmem:[%s274_s3] sm:$0xff]  }
   0x3   :  { %29 = vadd.xlane.f32.xlu0 %v28_v2  ;;  %193 = vmatpush3.bf16.msra.mxu0 %v202_v14  ;;  %v174_v24 = vld [vmem:[%s275_s1] ss:$0 sm:$0xff] }
   0x4   :  { %194 = vmatprep.subr.bf16.mxu0 %v209_v15  ;;  %v175_v26 = vld [vmem:[%s276_s2] ss:$0 sm:$0xff] }
   0x5   :  { %v178_v36 = vld [vmem:[%s277_s4] ss:$0 sm:$0xff] }
   0x7   :  { %32 = vadd.xlane.f32.xlu0 %v31_v3  ;;  %195 = vmatpush3.bf16.msra.mxu0 %v203_v16 }
  0x8c   :  { %v30_v4 = vpop.xlane.xlu0 %29 }
  0x8d   :  { %v35_v5 = vmul.f32 0.03125, %v30_v4 }
  0x8f   :  { %v37_v6 = vsub.f32 %v25_v0, %v35_v5 }
  0x90   :  { %v33_v7 = vpop.xlane.xlu0 %32 }
  0x91   :  { %v36_v8 = vmul.f32 0.03125, %v33_v7  ;;  %v39_v9 = vmul.f32 %v37_v6, %v37_v6 }
  0x93   :  { %v38_v10 = vsub.f32 %v26_v1, %v36_v8  ;;  %v41_v11 = vsel %vm27_vm0, %v39_v9, 0.0 }
  0x94   :  { %42 = vadd.xlane.f32.xlu1 %v41_v11 }
  0x95   :  { %v40_v12 = vmul.f32 %v38_v10, %v38_v10 }
  0x97   :  { %v44_v13 = vsel %vm27_vm0, %v40_v12, 0.0 }
  0x98   :  { %45 = vadd.xlane.f32.xlu1 %v44_v13 }
 0x11d   :  { %v43_v17 = vpop.xlane.xlu1 %42 }
 0x11e   :  { %v47_v18 = vmul.f32 0.03125, %v43_v17 }
 0x120   :  { %v49_v19 = vadd.f32 1e-05, %v47_v18 }
 0x121   :  { %v46_v20 = vpop.xlane.xlu1 %45 }
 0x122   :  { %205 = vrsqrt.f32 %v49_v19  ;;  %v48_v21 = vmul.f32 0.03125, %v46_v20 }
 0x124   :  { %v50_v22 = vadd.f32 1e-05, %v48_v21 }
 0x126   :  { %207 = vrsqrt.f32 %v50_v22 }
 0x12f   :  { %v206_v23 = vpop.eup %205 }
 0x130   :  { %v53_v25 = vmul.f32 %v206_v23, %v37_v6 }
 0x132   :  { %v62_v27 = vmul.f32 %v174_v24, %v53_v25 }
 0x133   :  { %v208_v28 = vpop.eup %207 }
 0x134   :  { %v71_v29 = vadd.f32 %v175_v26, %v62_v27  ;;  %v54_v30 = vmul.f32 %v208_v28, %v38_v10 }
 0x136   :  { %v185_v31 = vpack.c.bf16 %v71_v29, %v71_v29  ;;  %v63_v32 = vmul.f32 %v174_v24, %v54_v30 }
 0x138   :  { %82 = vst.msk [vmem:[#allocation2] sm:$0xf] %vm81_vm2, %v185_v31  ;;  %v72_v33 = vadd.f32 %v175_v26, %v63_v32 }
 0x13a   :  { %v186_v34 = vpack.c.bf16 %v72_v33, %v72_v33 }
 0x13c   :  { %83 = vst.msk [vmem:[#allocation2 + $0x4] sm:$0xf] %vm81_vm2, %v186_v34 }
 0x143   :  { %v204_v35 = vld [vmem:[#allocation2] sm:$0xff]  }
 0x144   :  { %197 = vmatmul.mubr.msk.bf16.vlgmr.msra.gmra.mxu0 %vm27_vm0, %v204_v35 }
 0x204   :  { %v152_v37 = vpop.f32.mrf.mxu0 }
 0x205   :  { %v153_v38 = vadd.f32 %v178_v36, %v152_v37 }
 0x206   :  { %v198_v39 = vpop.f32.mrf.mxu0 }
 0x207   :  { %v187_v40 = vpack.c.bf16 %v153_v38, %v153_v38 }
 0x208   :  { %v155_v41 = vpop.f32.mrf.mxu0 }
 0x209   :  { %168 = vst.msk [vmem:[%s278_s5] sm:$0xf] %vm167_vm3, %v187_v40  ;;  %v156_v42 = vadd.f32 %v178_v36, %v155_v41 }
 0x20a   :  { %v199_v43 = vpop.f32.mrf.mxu0 }
 0x20b   :  { %v188_v44 = vpack.c.bf16 %v156_v42, %v156_v42 }
 0x20d   :  { %169 = vst.msk [vmem:[%s278_s5 + $0x4] sm:$0xf] %vm167_vm3, %v188_v44 }

// kernel: test_model_forward.14
= control target key start
LH: loop header
LB: loop body
LE: loop exit
PB: predicated region body
PF: predicated region fallthrough
CT: control target
= control target key end

     0   :  { %v199_v0 = vmov 0.0   ;;  %vm200_vm0 = vmmov 0   ;;  %vm142_vm1 = vcmask 261120   ;;  %s268_s1 = inlined_call_operand.vmem [shape: bf16[128,32], index: 1, kind: input, shape index: {}]   ;;  %s269_s0 = inlined_call_operand.vmem [shape: bf16[16,128], index: 0, kind: input, shape index: {}]   ;;  %s270_s2 = inlined_call_operand.vmem [shape: f32[1,32], index: 2, kind: input, shape index: {}]   ;;  %s271_s3 = inlined_call_operand.vmem [shape: f32[16,32], index: 3, kind: input, shape index: {}]   ;;  %s272_s4 = inlined_call_operand.vmem [shape: f32[16,32], index: 4, kind: output, shape index: {}]  }
   0x1   :  { %168 = vmatprep.subr.bf16.mxu0 %v199_v0  ;;  %v190_v1 = vld [vmem:[%s268_s1 + $0x38] sm:$0xff]   ;;  %184 = vmatprep.mubr.msk.bf16.mxu0 %vm200_vm0, %v199_v0  ;;  %v191_v2 = vld [vmem:[%s268_s1 + $0x30] sm:$0xff]   ;;  %v192_v3 = vld [vmem:[%s268_s1 + $0x28] sm:$0xff]  }
   0x2   :  { %169 = vmatpush3.bf16.msra.mxu0 %v190_v1  ;;  %v193_v4 = vld [vmem:[%s268_s1 + $0x20] sm:$0xff]   ;;  %v194_v5 = vld [vmem:[%s268_s1 + $0x18] sm:$0xff]   ;;  %v195_v6 = vld [vmem:[%s268_s1 + $0x10] sm:$0xff]  }
   0x3   :  { %170 = vmatprep.subr.bf16.mxu0 %v199_v0  ;;  %v196_v7 = vld [vmem:[%s268_s1 + $0x8] sm:$0xff]   ;;  %v197_v8 = vld [vmem:[%s268_s1] sm:$0xff]  }
   0x4   :  { %v198_v9 = vld [vmem:[%s269_s0] sm:$0xff]   ;;  %v139_v17 = vld [vmem:[%s271_s3 + $0x8] sm:$0xff] }
   0x5   :  { %v149_v10 = vld [vmem:[%s270_s2] ss:$0 sm:$0xff] }
   0x6   :  { %171 = vmatpush3.bf16.msra.mxu0 %v191_v2  ;;  %v138_v12 = vld [vmem:[%s271_s3] sm:$0xff] }
   0x7   :  { %172 = vmatprep.subr.bf16.mxu0 %v199_v0 }
   0xa   :  { %173 = vmatpush3.bf16.msra.mxu0 %v192_v3 }
   0xb   :  { %174 = vmatprep.subr.bf16.mxu0 %v199_v0 }
   0xe   :  { %175 = vmatpush3.bf16.msra.mxu0 %v193_v4 }
   0xf   :  { %176 = vmatprep.subr.bf16.mxu0 %v199_v0 }
  0x12   :  { %177 = vmatpush3.bf16.msra.mxu0 %v194_v5 }
  0x13   :  { %178 = vmatprep.subr.bf16.mxu0 %v199_v0 }
  0x16   :  { %179 = vmatpush3.bf16.msra.mxu0 %v195_v6 }
  0x17   :  { %180 = vmatprep.subr.bf16.mxu0 %v199_v0 }
  0x1a   :  { %181 = vmatpush3.bf16.msra.mxu0 %v196_v7 }
  0x1b   :  { %182 = vmatprep.subr.bf16.mxu0 %v199_v0 }
  0x1e   :  { %183 = vmatpush3.bf16.msra.mxu0 %v197_v8 }
  0x21   :  { %185 = vmatmul.mubr.bf16.vlgmr.msra.gmra.mxu0 %v198_v9 }
  0xe1   :  { %v131_v11 = vpop.f32.mrf.mxu0 }
  0xe2   :  { %v132_v13 = vadd.f32 %v149_v10, %v131_v11 }
  0xe3   :  { %v186_v14 = vpop.f32.mrf.mxu0 }
  0xe4   :  { %v140_v15 = vadd.f32 %v138_v12, %v132_v13 }
  0xe5   :  { %v134_v16 = vpop.f32.mrf.mxu0 }
  0xe6   :  { %143 = vst.msk [vmem:[%s272_s4] sm:$0xff] %vm142_vm1, %v140_v15  ;;  %v135_v18 = vadd.f32 %v149_v10, %v134_v16 }
  0xe7   :  { %v187_v19 = vpop.f32.mrf.mxu0 }
  0xe8   :  { %v141_v20 = vadd.f32 %v139_v17, %v135_v18 }
  0xea   :  { %144 = vst.msk [vmem:[%s272_s4 + $0x8] sm:$0xff] %vm142_vm1, %v141_v20 }

</bundles_post_ra>
